<compile_context>
chip_gen: v7x
topology: tpu7x:2x2x1
jax: 0.10.0
libtpu: 0.0.40
codegen_flags: <defaults>
</compile_context>

<pallas_src>
import numpy as np
import jax
import jax.numpy as jnp
from jax.experimental import pallas as pl
from jax.experimental.pallas import tpu as pltpu


# ---------------------------------------------------------------------------
# Trace-time constants (numpy): fused conv gather matrices + bilinear matrix
# ---------------------------------------------------------------------------

def _gather_mats(h, w, kh, kw, stride, pad):
    """Fused 0/1 tap-selection matrix, lane-concatenated: G : (h*w, kh*kw*ho*wo).

    (X @ G)[c, t*ho*wo + o] == padded-input value of channel c at tap t for output o
    (zero where the tap lands in padding). Tap order t = di*kw + dj matches the
    flattened (Cout, 9*Cin) weight layout produced by _prep_params.
    """
    ho = (h + 2 * pad - kh) // stride + 1
    wo = (w + 2 * pad - kw) // stride + 1
    g = np.zeros((kh * kw, h * w, ho * wo), np.float32)
    for di in range(kh):
        for dj in range(kw):
            t = di * kw + dj
            for oy in range(ho):
                iy = oy * stride + di - pad
                if iy < 0 or iy >= h:
                    continue
                for ox in range(wo):
                    ix = ox * stride + dj - pad
                    if ix < 0 or ix >= w:
                        continue
                    g[t, iy * w + ix, oy * wo + ox] = 1.0
    g_cat = np.transpose(g, (1, 0, 2)).reshape(h * w, kh * kw * ho * wo)
    return g_cat, (ho, wo)


def _bilinear_matrix(out_size, in_size):
    # PyTorch F.interpolate(mode="bilinear", align_corners=False) weights.
    i = np.arange(out_size)
    src = (i + 0.5) * in_size / out_size - 0.5
    src = np.clip(src, 0.0, in_size - 1)
    lo = np.floor(src).astype(np.int64)
    hi = np.minimum(lo + 1, in_size - 1)
    frac = (src - lo).astype(np.float32)
    m = np.zeros((out_size, in_size), dtype=np.float32)
    m[np.arange(out_size), lo] += 1.0 - frac
    m[np.arange(out_size), hi] += frac
    return m


# ---------------------------------------------------------------------------
# Fused Pallas kernel: one grid step == one batch element, everything in VMEM
# ---------------------------------------------------------------------------

def _fused_kernel(x_ref, g1_ref, g2_ref, g3_ref, ut_ref,
                  w1_ref, b1_ref, w2_ref, b2_ref,
                  wa1_ref, ba1_ref, wa3_ref, ba3_ref,
                  wap_ref, bap_ref, wpr_ref, bpr_ref,
                  wcl_ref, bcl_ref, o_ref):
    cdt = x_ref.dtype  # bf16 compute dtype for the MXU inputs

    def conv3x3(xt, g_ref, w_ref, b_ref, relu):
        # xt: (Cin, S_in); g_ref: (S_in, 9*S_out); w_ref: (Cout, 9*Cin); b_ref: (Cout, 1)
        s_out = g_ref.shape[1] // 9
        # 1) ONE wide gather matmul for all 9 taps (one-hot columns -> exact in bf16).
        z = jnp.dot(xt, g_ref[...], preferred_element_type=jnp.float32).astype(cdt)
        # 2) Restack taps along the sublane/channel axis: row index = t*Cin + ci.
        zcol = jnp.concatenate(
            [z[:, t * s_out:(t + 1) * s_out] for t in range(9)], axis=0)
        # 3) ONE fat weight matmul with K = 9*Cin.
        y = jnp.dot(w_ref[...], zcol, preferred_element_type=jnp.float32) + b_ref[...]
        return jnp.maximum(y, 0.0) if relu else y

    def conv1x1(xt, w_ref, b_ref, relu):
        # xt: (Cin, S); w_ref: (Cout, Cin); b_ref: (Cout, 1)
        y = jnp.dot(w_ref[...], xt, preferred_element_type=jnp.float32) + b_ref[...]
        return jnp.maximum(y, 0.0) if relu else y

    x = x_ref[0]                                                     # (3, H*W)

    # Backbone (output stride 4)
    f1 = conv3x3(x, g1_ref, w1_ref, b1_ref, True).astype(cdt)        # (8,  H*W/4)
    f2_f32 = conv3x3(f1, g2_ref, w2_ref, b2_ref, True)               # (16, H*W/16) f32
    f2 = f2_f32.astype(cdt)

    # ASPP head
    a1 = conv1x1(f2, wa1_ref, ba1_ref, True)                         # (16, S) f32
    a3 = conv3x3(f2, g3_ref, wa3_ref, ba3_ref, True)                 # (16, S) f32
    gp = jnp.mean(f2_f32, axis=1, keepdims=True)                     # (16, 1) f32 pool
    gp = conv1x1(gp.astype(cdt), wap_ref, bap_ref, True)             # (16, 1) f32
    ap = jnp.broadcast_to(gp, a1.shape)                              # image pooling

    cat = jnp.concatenate([a1, a3, ap], axis=0).astype(cdt)          # (48, S)
    proj = conv1x1(cat, wpr_ref, bpr_ref, True).astype(cdt)          # (16, S)
    logits = conv1x1(proj, wcl_ref, bcl_ref, False)                  # (2,  S) f32

    # Bilinear upsample back to input resolution: one f32 matmul with kron(Rh, Rw)^T.
    out = jnp.dot(logits, ut_ref[...], preferred_element_type=jnp.float32)  # (2, H*W)
    o_ref[0] = out.astype(o_ref.dtype)


# ---------------------------------------------------------------------------
# Synthetic DeepLabV3-style model params (deterministic init, same as before)
# ---------------------------------------------------------------------------

def init_params(key, in_ch=3, num_classes=2):
    ks = jax.random.split(key, 14)

    def w(k, shape, scale=0.1):
        return jax.random.normal(k, shape, jnp.float32) * scale

    p = {}
    p["bb1_w"] = w(ks[0], (3, 3, in_ch, 8));   p["bb1_b"] = w(ks[1], (8,), 0.01)
    p["bb2_w"] = w(ks[2], (3, 3, 8, 16));      p["bb2_b"] = w(ks[3], (16,), 0.01)
    p["aspp1_w"] = w(ks[4], (1, 1, 16, 16));   p["aspp1_b"] = w(ks[5], (16,), 0.01)
    p["aspp3_w"] = w(ks[6], (3, 3, 16, 16), 0.05); p["aspp3_b"] = w(ks[7], (16,), 0.01)
    p["asppp_w"] = w(ks[8], (1, 1, 16, 16));   p["asppp_b"] = w(ks[9], (16,), 0.01)
    p["proj_w"] = w(ks[10], (1, 1, 48, 16));   p["proj_b"] = w(ks[11], (16,), 0.01)
    p["cls_w"] = w(ks[12], (1, 1, 16, num_classes))
    p["cls_b"] = w(ks[13], (num_classes,), 0.01)
    return p


def _prep_params(params, cdt):
    """Repack PyTorch-layout conv weights into the kernel's fused/transposed layout."""
    def t33(w):  # (3,3,Cin,Cout) -> (Cout, 9*Cin); col index = (di*3+dj)*Cin + ci
        kh, kw, ci, co = w.shape
        return jnp.transpose(w, (3, 0, 1, 2)).reshape(co, kh * kw * ci).astype(cdt)

    def t11(w):  # (1,1,Cin,Cout) -> (Cout, Cin)
        return jnp.transpose(w[0, 0], (1, 0)).astype(cdt)

    def col(b):  # (C,) -> (C,1) f32 bias column (broadcasts over spatial lanes)
        return b.reshape(-1, 1).astype(jnp.float32)

    return [
        t33(params["bb1_w"]),  col(params["bb1_b"]),
        t33(params["bb2_w"]),  col(params["bb2_b"]),
        t11(params["aspp1_w"]), col(params["aspp1_b"]),
        t33(params["aspp3_w"]), col(params["aspp3_b"]),
        t11(params["asppp_w"]), col(params["asppp_b"]),
        t11(params["proj_w"]),  col(params["proj_b"]),
        t11(params["cls_w"]),   col(params["cls_b"]),
    ]


# ---------------------------------------------------------------------------
# ModelWrapper.forward equivalent: returns model(x)['out'] in NCHW
# ---------------------------------------------------------------------------

def model_wrapper_forward(params, x_nchw, *, compute_dtype=jnp.bfloat16):
    N, cin, H, W = x_nchw.shape
    num_classes = params["cls_b"].shape[0]
    cdt = compute_dtype

    # Static geometry -> fused gather / upsample matrices (built at trace time).
    g1_np, (h1, w1) = _gather_mats(H, W, 3, 3, 2, 1)      # conv1: H x W  -> h1 x w1
    g2_np, (h2, w2) = _gather_mats(h1, w1, 3, 3, 2, 1)    # conv2: h1 x w1 -> h2 x w2
    g3_np, _ = _gather_mats(h2, w2, 3, 3, 1, 1)           # ASPP 3x3 (stride 1)
    up_t_np = np.kron(_bilinear_matrix(H, h2),
                      _bilinear_matrix(W, w2)).T.astype(np.float32)  # (h2*w2, H*W), f32

    # NCHW == (C, spatial) layout: no transpose needed on input or output.
    x = x_nchw.reshape(N, cin, H * W).astype(cdt)
    # Pad batch to an even grid so v7x's two TensorCores split "parallel" steps evenly.
    n_pad = N + (N % 2)
    if n_pad != N:
        x = jnp.concatenate([x, jnp.zeros((1, cin, H * W), cdt)], axis=0)

    consts = [jnp.asarray(g1_np, cdt), jnp.asarray(g2_np, cdt),
              jnp.asarray(g3_np, cdt), jnp.asarray(up_t_np, jnp.float32)]
    operands = [x] + consts + _prep_params(params, cdt)

    in_specs = [pl.BlockSpec((1, cin, H * W), lambda n: (n, 0, 0))]
    for a in operands[1:]:
        nd = a.ndim
        # Grid-invariant constants: single-buffer them (double buffering = pure VMEM waste).
        in_specs.append(pl.BlockSpec(a.shape, lambda n, _nd=nd: (0,) * _nd,
                                     pipeline_mode=pl.Buffered(1)))

    # Advisory cost estimate (helps XLA schedule around the fused custom call).
    def mm(m, k, n):
        return 2 * m * k * n
    s1, s2 = h1 * w1, h2 * w2
    flops_per_sample = (
        mm(cin, H * W, 9 * s1) + mm(8, 9 * cin, s1) +      # backbone conv1
        mm(8, s1, 9 * s2) + mm(16, 9 * 8, s2) +            # backbone conv2
        mm(16, 16, s2) +                                    # ASPP 1x1
        mm(16, s2, 9 * s2) + mm(16, 9 * 16, s2) +           # ASPP 3x3
        mm(16, 16, 1) +                                     # ASPP image pool 1x1
        mm(16, 48, s2) +                                    # projection
        mm(num_classes, 16, s2) +                           # classifier
        mm(num_classes, s2, H * W))                         # bilinear upsample
    operand_bytes = sum(int(np.prod(a.shape)) * a.dtype.itemsize for a in operands)
    out_bytes = n_pad * num_classes * H * W * 4
    cost = pl.CostEstimate(flops=int(n_pad * flops_per_sample),
                           transcendentals=0,
                           bytes_accessed=int(operand_bytes + out_bytes))

    # Explicit scoped-VMEM limit sized from the real footprint (cap at v7x's 64 MiB).
    const_bytes = sum(int(np.prod(a.shape)) * a.dtype.itemsize for a in operands[1:])
    block_bytes = cin * H * W * x.dtype.itemsize + num_classes * H * W * 4
    vmem_limit = int(min(64 << 20,
                         max(32 << 20, 2 * (const_bytes + 2 * block_bytes) + (8 << 20))))

    out = pl.pallas_call(
        _fused_kernel,
        out_shape=jax.ShapeDtypeStruct((n_pad, num_classes, H * W), jnp.float32),
        grid=(n_pad,),
        in_specs=in_specs,
        out_specs=pl.BlockSpec((1, num_classes, H * W), lambda n: (n, 0, 0)),
        compiler_params=pltpu.CompilerParams(
            dimension_semantics=("parallel",),   # batch blocks shard v7x's 2 TCs
            vmem_limit_bytes=vmem_limit),
        cost_estimate=cost,
    )(*operands)

    return out[:N].reshape(N, num_classes, H, W)            # already NCHW


if __name__ == "__main__":
    key = jax.random.PRNGKey(0)
    pkey, xkey = jax.random.split(key)
    params = init_params(pkey, in_ch=3, num_classes=2)
    x = jax.random.normal(xkey, (2, 3, 16, 16), jnp.float32)   # NCHW like PyTorch
    fwd = jax.jit(model_wrapper_forward)
    out = fwd(params, x)
    jax.block_until_ready(out)
    assert out.shape == (2, 2, 16, 16), out.shape
    assert out.dtype == jnp.float32
    assert bool(jnp.all(jnp.isfinite(out)))
    print("KERNEL_OK")
</pallas_src>

<mosaic_0001>
module attributes {stable_mosaic.version = 11 : i64} {
  func.func @_fused_kernel(%arg0: i32, %arg1: memref<1x3x256xbf16, #tpu.memory_space<vmem>>, %arg2: memref<256x576xbf16, #tpu.memory_space<vmem>>, %arg3: memref<64x144xbf16, #tpu.memory_space<vmem>>, %arg4: memref<16x144xbf16, #tpu.memory_space<vmem>>, %arg5: memref<16x256xf32, #tpu.memory_space<vmem>>, %arg6: memref<8x27xbf16, #tpu.memory_space<vmem>>, %arg7: memref<8x1xf32, #tpu.memory_space<vmem>>, %arg8: memref<16x72xbf16, #tpu.memory_space<vmem>>, %arg9: memref<16x1xf32, #tpu.memory_space<vmem>>, %arg10: memref<16x16xbf16, #tpu.memory_space<vmem>>, %arg11: memref<16x1xf32, #tpu.memory_space<vmem>>, %arg12: memref<16x144xbf16, #tpu.memory_space<vmem>>, %arg13: memref<16x1xf32, #tpu.memory_space<vmem>>, %arg14: memref<16x16xbf16, #tpu.memory_space<vmem>>, %arg15: memref<16x1xf32, #tpu.memory_space<vmem>>, %arg16: memref<16x48xbf16, #tpu.memory_space<vmem>>, %arg17: memref<16x1xf32, #tpu.memory_space<vmem>>, %arg18: memref<2x16xbf16, #tpu.memory_space<vmem>>, %arg19: memref<2x1xf32, #tpu.memory_space<vmem>>, %arg20: memref<1x2x256xf32, #tpu.memory_space<vmem>>) attributes {dimension_semantics = [#tpu.dimension_semantics<parallel>], iteration_bounds = array<i64: 2>, scalar_prefetch = 0 : i64, scratch_operands = 0 : i64, tpu.core_type = #tpu.core_type<tc>, window_params = [{transform_indices = @transform_0, window_bounds = array<i64: 1, 3, 256>}, {pipeline_mode = #tpu.pipeline_mode<synchronous>, transform_indices = @transform_1, window_bounds = array<i64: 256, 576>}, {pipeline_mode = #tpu.pipeline_mode<synchronous>, transform_indices = @transform_2, window_bounds = array<i64: 64, 144>}, {pipeline_mode = #tpu.pipeline_mode<synchronous>, transform_indices = @transform_3, window_bounds = array<i64: 16, 144>}, {pipeline_mode = #tpu.pipeline_mode<synchronous>, transform_indices = @transform_4, window_bounds = array<i64: 16, 256>}, {pipeline_mode = #tpu.pipeline_mode<synchronous>, transform_indices = @transform_5, window_bounds = array<i64: 8, 27>}, {pipeline_mode = #tpu.pipeline_mode<synchronous>, transform_indices = @transform_6, window_bounds = array<i64: 8, 1>}, {pipeline_mode = #tpu.pipeline_mode<synchronous>, transform_indices = @transform_7, window_bounds = array<i64: 16, 72>}, {pipeline_mode = #tpu.pipeline_mode<synchronous>, transform_indices = @transform_8, window_bounds = array<i64: 16, 1>}, {pipeline_mode = #tpu.pipeline_mode<synchronous>, transform_indices = @transform_9, window_bounds = array<i64: 16, 16>}, {pipeline_mode = #tpu.pipeline_mode<synchronous>, transform_indices = @transform_10, window_bounds = array<i64: 16, 1>}, {pipeline_mode = #tpu.pipeline_mode<synchronous>, transform_indices = @transform_11, window_bounds = array<i64: 16, 144>}, {pipeline_mode = #tpu.pipeline_mode<synchronous>, transform_indices = @transform_12, window_bounds = array<i64: 16, 1>}, {pipeline_mode = #tpu.pipeline_mode<synchronous>, transform_indices = @transform_13, window_bounds = array<i64: 16, 16>}, {pipeline_mode = #tpu.pipeline_mode<synchronous>, transform_indices = @transform_14, window_bounds = array<i64: 16, 1>}, {pipeline_mode = #tpu.pipeline_mode<synchronous>, transform_indices = @transform_15, window_bounds = array<i64: 16, 48>}, {pipeline_mode = #tpu.pipeline_mode<synchronous>, transform_indices = @transform_16, window_bounds = array<i64: 16, 1>}, {pipeline_mode = #tpu.pipeline_mode<synchronous>, transform_indices = @transform_17, window_bounds = array<i64: 2, 16>}, {pipeline_mode = #tpu.pipeline_mode<synchronous>, transform_indices = @transform_18, window_bounds = array<i64: 2, 1>}, {transform_indices = @transform_19, window_bounds = array<i64: 1, 2, 256>}]} {
    %c0 = arith.constant 0 : index
    %c0_0 = arith.constant 0 : index
    %c0_1 = arith.constant 0 : index
    %0 = vector.load %arg1[%c0, %c0_0, %c0_1] : memref<1x3x256xbf16, #tpu.memory_space<vmem>>, vector<1x3x256xbf16>
    %1 = vector.shape_cast %0 : vector<1x3x256xbf16> to vector<3x256xbf16>
    %c0_2 = arith.constant 0 : index
    %c0_3 = arith.constant 0 : index
    %2 = vector.load %arg2[%c0_2, %c0_3] : memref<256x576xbf16, #tpu.memory_space<vmem>>, vector<256x576xbf16>
    %cst = arith.constant dense<0.000000e+00> : vector<3x576xf32>
    %3 = tpu.matmul %1, %2, %cst {dimension_numbers = #tpu.dot_dimension_numbers<[1], [0], [0], [1], [0, 0, 1, 1], [], []>} : vector<3x256xbf16>, vector<256x576xbf16>, vector<3x576xf32> -> vector<3x576xf32>
    %4 = arith.truncf %3 : vector<3x576xf32> to vector<3x576xbf16>
    %5 = vector.extract_strided_slice %4 {offsets = [0, 0], sizes = [3, 64], strides = [1, 1]} : vector<3x576xbf16> to vector<3x64xbf16>
    %6 = vector.extract_strided_slice %4 {offsets = [0, 64], sizes = [3, 64], strides = [1, 1]} : vector<3x576xbf16> to vector<3x64xbf16>
    %7 = vector.extract_strided_slice %4 {offsets = [0, 128], sizes = [3, 64], strides = [1, 1]} : vector<3x576xbf16> to vector<3x64xbf16>
    %8 = vector.extract_strided_slice %4 {offsets = [0, 192], sizes = [3, 64], strides = [1, 1]} : vector<3x576xbf16> to vector<3x64xbf16>
    %9 = vector.extract_strided_slice %4 {offsets = [0, 256], sizes = [3, 64], strides = [1, 1]} : vector<3x576xbf16> to vector<3x64xbf16>
    %10 = vector.extract_strided_slice %4 {offsets = [0, 320], sizes = [3, 64], strides = [1, 1]} : vector<3x576xbf16> to vector<3x64xbf16>
    %11 = vector.extract_strided_slice %4 {offsets = [0, 384], sizes = [3, 64], strides = [1, 1]} : vector<3x576xbf16> to vector<3x64xbf16>
    %12 = vector.extract_strided_slice %4 {offsets = [0, 448], sizes = [3, 64], strides = [1, 1]} : vector<3x576xbf16> to vector<3x64xbf16>
    %13 = vector.extract_strided_slice %4 {offsets = [0, 512], sizes = [3, 64], strides = [1, 1]} : vector<3x576xbf16> to vector<3x64xbf16>
    %14 = tpu.concatenate %5, %6, %7, %8, %9, %10, %11, %12, %13 in 0 : vector<3x64xbf16>, vector<3x64xbf16>, vector<3x64xbf16>, vector<3x64xbf16>, vector<3x64xbf16>, vector<3x64xbf16>, vector<3x64xbf16>, vector<3x64xbf16>, vector<3x64xbf16> -> vector<27x64xbf16>
    %c0_4 = arith.constant 0 : index
    %c0_5 = arith.constant 0 : index
    %15 = vector.load %arg6[%c0_4, %c0_5] : memref<8x27xbf16, #tpu.memory_space<vmem>>, vector<8x27xbf16>
    %cst_6 = arith.constant dense<0.000000e+00> : vector<8x64xf32>
    %16 = tpu.matmul %15, %14, %cst_6 {dimension_numbers = #tpu.dot_dimension_numbers<[1], [0], [0], [1], [0, 0, 1, 1], [], []>} : vector<8x27xbf16>, vector<27x64xbf16>, vector<8x64xf32> -> vector<8x64xf32>
    %c0_7 = arith.constant 0 : index
    %c0_8 = arith.constant 0 : index
    %17 = vector.load %arg7[%c0_7, %c0_8] : memref<8x1xf32, #tpu.memory_space<vmem>>, vector<8x1xf32>
    %18 = vector.broadcast %17 : vector<8x1xf32> to vector<8x64xf32>
    %19 = arith.addf %16, %18 : vector<8x64xf32>
    %cst_9 = arith.constant 0.000000e+00 : f32
    %20 = vector.broadcast %cst_9 : f32 to vector<8x64xf32>
    %21 = arith.maximumf %19, %20 : vector<8x64xf32>
    %22 = arith.truncf %21 : vector<8x64xf32> to vector<8x64xbf16>
    %c0_10 = arith.constant 0 : index
    %c0_11 = arith.constant 0 : index
    %23 = vector.load %arg3[%c0_10, %c0_11] : memref<64x144xbf16, #tpu.memory_space<vmem>>, vector<64x144xbf16>
    %cst_12 = arith.constant dense<0.000000e+00> : vector<8x144xf32>
    %24 = tpu.matmul %22, %23, %cst_12 {dimension_numbers = #tpu.dot_dimension_numbers<[1], [0], [0], [1], [0, 0, 1, 1], [], []>} : vector<8x64xbf16>, vector<64x144xbf16>, vector<8x144xf32> -> vector<8x144xf32>
    %25 = arith.truncf %24 : vector<8x144xf32> to vector<8x144xbf16>
    %26 = vector.extract_strided_slice %25 {offsets = [0, 0], sizes = [8, 16], strides = [1, 1]} : vector<8x144xbf16> to vector<8x16xbf16>
    %27 = vector.extract_strided_slice %25 {offsets = [0, 16], sizes = [8, 16], strides = [1, 1]} : vector<8x144xbf16> to vector<8x16xbf16>
    %28 = vector.extract_strided_slice %25 {offsets = [0, 32], sizes = [8, 16], strides = [1, 1]} : vector<8x144xbf16> to vector<8x16xbf16>
    %29 = vector.extract_strided_slice %25 {offsets = [0, 48], sizes = [8, 16], strides = [1, 1]} : vector<8x144xbf16> to vector<8x16xbf16>
    %30 = vector.extract_strided_slice %25 {offsets = [0, 64], sizes = [8, 16], strides = [1, 1]} : vector<8x144xbf16> to vector<8x16xbf16>
    %31 = vector.extract_strided_slice %25 {offsets = [0, 80], sizes = [8, 16], strides = [1, 1]} : vector<8x144xbf16> to vector<8x16xbf16>
    %32 = vector.extract_strided_slice %25 {offsets = [0, 96], sizes = [8, 16], strides = [1, 1]} : vector<8x144xbf16> to vector<8x16xbf16>
    %33 = vector.extract_strided_slice %25 {offsets = [0, 112], sizes = [8, 16], strides = [1, 1]} : vector<8x144xbf16> to vector<8x16xbf16>
    %34 = vector.extract_strided_slice %25 {offsets = [0, 128], sizes = [8, 16], strides = [1, 1]} : vector<8x144xbf16> to vector<8x16xbf16>
    %35 = tpu.concatenate %26, %27, %28, %29, %30, %31, %32, %33, %34 in 0 : vector<8x16xbf16>, vector<8x16xbf16>, vector<8x16xbf16>, vector<8x16xbf16>, vector<8x16xbf16>, vector<8x16xbf16>, vector<8x16xbf16>, vector<8x16xbf16>, vector<8x16xbf16> -> vector<72x16xbf16>
    %c0_13 = arith.constant 0 : index
    %c0_14 = arith.constant 0 : index
    %36 = vector.load %arg8[%c0_13, %c0_14] : memref<16x72xbf16, #tpu.memory_space<vmem>>, vector<16x72xbf16>
    %cst_15 = arith.constant dense<0.000000e+00> : vector<16x16xf32>
    %37 = tpu.matmul %36, %35, %cst_15 {dimension_numbers = #tpu.dot_dimension_numbers<[1], [0], [0], [1], [0, 0, 1, 1], [], []>} : vector<16x72xbf16>, vector<72x16xbf16>, vector<16x16xf32> -> vector<16x16xf32>
    %c0_16 = arith.constant 0 : index
    %c0_17 = arith.constant 0 : index
    %38 = vector.load %arg9[%c0_16, %c0_17] : memref<16x1xf32, #tpu.memory_space<vmem>>, vector<16x1xf32>
    %39 = vector.broadcast %38 : vector<16x1xf32> to vector<16x16xf32>
    %40 = arith.addf %37, %39 : vector<16x16xf32>
    %cst_18 = arith.constant 0.000000e+00 : f32
    %41 = vector.broadcast %cst_18 : f32 to vector<16x16xf32>
    %42 = arith.maximumf %40, %41 : vector<16x16xf32>
    %43 = arith.truncf %42 : vector<16x16xf32> to vector<16x16xbf16>
    %c0_19 = arith.constant 0 : index
    %c0_20 = arith.constant 0 : index
    %44 = vector.load %arg10[%c0_19, %c0_20] : memref<16x16xbf16, #tpu.memory_space<vmem>>, vector<16x16xbf16>
    %cst_21 = arith.constant dense<0.000000e+00> : vector<16x16xf32>
    %45 = tpu.matmul %44, %43, %cst_21 {dimension_numbers = #tpu.dot_dimension_numbers<[1], [0], [0], [1], [0, 0, 1, 1], [], []>} : vector<16x16xbf16>, vector<16x16xbf16>, vector<16x16xf32> -> vector<16x16xf32>
    %c0_22 = arith.constant 0 : index
    %c0_23 = arith.constant 0 : index
    %46 = vector.load %arg11[%c0_22, %c0_23] : memref<16x1xf32, #tpu.memory_space<vmem>>, vector<16x1xf32>
    %47 = vector.broadcast %46 : vector<16x1xf32> to vector<16x16xf32>
    %48 = arith.addf %45, %47 : vector<16x16xf32>
    %cst_24 = arith.constant 0.000000e+00 : f32
    %49 = vector.broadcast %cst_24 : f32 to vector<16x16xf32>
    %50 = arith.maximumf %48, %49 : vector<16x16xf32>
    %c0_25 = arith.constant 0 : index
    %c0_26 = arith.constant 0 : index
    %51 = vector.load %arg4[%c0_25, %c0_26] : memref<16x144xbf16, #tpu.memory_space<vmem>>, vector<16x144xbf16>
    %cst_27 = arith.constant dense<0.000000e+00> : vector<16x144xf32>
    %52 = tpu.matmul %43, %51, %cst_27 {dimension_numbers = #tpu.dot_dimension_numbers<[1], [0], [0], [1], [0, 0, 1, 1], [], []>} : vector<16x16xbf16>, vector<16x144xbf16>, vector<16x144xf32> -> vector<16x144xf32>
    %53 = arith.truncf %52 : vector<16x144xf32> to vector<16x144xbf16>
    %54 = vector.extract_strided_slice %53 {offsets = [0, 0], sizes = [16, 16], strides = [1, 1]} : vector<16x144xbf16> to vector<16x16xbf16>
    %55 = vector.extract_strided_slice %53 {offsets = [0, 16], sizes = [16, 16], strides = [1, 1]} : vector<16x144xbf16> to vector<16x16xbf16>
    %56 = vector.extract_strided_slice %53 {offsets = [0, 32], sizes = [16, 16], strides = [1, 1]} : vector<16x144xbf16> to vector<16x16xbf16>
    %57 = vector.extract_strided_slice %53 {offsets = [0, 48], sizes = [16, 16], strides = [1, 1]} : vector<16x144xbf16> to vector<16x16xbf16>
    %58 = vector.extract_strided_slice %53 {offsets = [0, 64], sizes = [16, 16], strides = [1, 1]} : vector<16x144xbf16> to vector<16x16xbf16>
    %59 = vector.extract_strided_slice %53 {offsets = [0, 80], sizes = [16, 16], strides = [1, 1]} : vector<16x144xbf16> to vector<16x16xbf16>
    %60 = vector.extract_strided_slice %53 {offsets = [0, 96], sizes = [16, 16], strides = [1, 1]} : vector<16x144xbf16> to vector<16x16xbf16>
    %61 = vector.extract_strided_slice %53 {offsets = [0, 112], sizes = [16, 16], strides = [1, 1]} : vector<16x144xbf16> to vector<16x16xbf16>
    %62 = vector.extract_strided_slice %53 {offsets = [0, 128], sizes = [16, 16], strides = [1, 1]} : vector<16x144xbf16> to vector<16x16xbf16>
    %63 = tpu.concatenate %54, %55, %56, %57, %58, %59, %60, %61, %62 in 0 : vector<16x16xbf16>, vector<16x16xbf16>, vector<16x16xbf16>, vector<16x16xbf16>, vector<16x16xbf16>, vector<16x16xbf16>, vector<16x16xbf16>, vector<16x16xbf16>, vector<16x16xbf16> -> vector<144x16xbf16>
    %c0_28 = arith.constant 0 : index
    %c0_29 = arith.constant 0 : index
    %64 = vector.load %arg12[%c0_28, %c0_29] : memref<16x144xbf16, #tpu.memory_space<vmem>>, vector<16x144xbf16>
    %cst_30 = arith.constant dense<0.000000e+00> : vector<16x16xf32>
    %65 = tpu.matmul %64, %63, %cst_30 {dimension_numbers = #tpu.dot_dimension_numbers<[1], [0], [0], [1], [0, 0, 1, 1], [], []>} : vector<16x144xbf16>, vector<144x16xbf16>, vector<16x16xf32> -> vector<16x16xf32>
    %c0_31 = arith.constant 0 : index
    %c0_32 = arith.constant 0 : index
    %66 = vector.load %arg13[%c0_31, %c0_32] : memref<16x1xf32, #tpu.memory_space<vmem>>, vector<16x1xf32>
    %67 = vector.broadcast %66 : vector<16x1xf32> to vector<16x16xf32>
    %68 = arith.addf %65, %67 : vector<16x16xf32>
    %cst_33 = arith.constant 0.000000e+00 : f32
    %69 = vector.broadcast %cst_33 : f32 to vector<16x16xf32>
    %70 = arith.maximumf %68, %69 : vector<16x16xf32>
    %cst_34 = arith.constant dense<0.000000e+00> : vector<16xf32>
    %71 = vector.multi_reduction <add>, %42, %cst_34 [1] : vector<16x16xf32> to vector<16xf32>
    %72 = vector.shape_cast %71 : vector<16xf32> to vector<16x1xf32>
    %cst_35 = arith.constant 1.600000e+01 : f32
    %73 = vector.broadcast %cst_35 : f32 to vector<16x1xf32>
    %74 = arith.divf %72, %73 : vector<16x1xf32>
    %75 = arith.truncf %74 : vector<16x1xf32> to vector<16x1xbf16>
    %c0_36 = arith.constant 0 : index
    %c0_37 = arith.constant 0 : index
    %76 = vector.load %arg14[%c0_36, %c0_37] : memref<16x16xbf16, #tpu.memory_space<vmem>>, vector<16x16xbf16>
    %cst_38 = arith.constant dense<0.000000e+00> : vector<16x1xf32>
    %77 = tpu.matmul %76, %75, %cst_38 {dimension_numbers = #tpu.dot_dimension_numbers<[1], [0], [0], [1], [0, 0, 1, 1], [], []>} : vector<16x16xbf16>, vector<16x1xbf16>, vector<16x1xf32> -> vector<16x1xf32>
    %c0_39 = arith.constant 0 : index
    %c0_40 = arith.constant 0 : index
    %78 = vector.load %arg15[%c0_39, %c0_40] : memref<16x1xf32, #tpu.memory_space<vmem>>, vector<16x1xf32>
    %79 = arith.addf %77, %78 : vector<16x1xf32>
    %cst_41 = arith.constant 0.000000e+00 : f32
    %80 = vector.broadcast %cst_41 : f32 to vector<16x1xf32>
    %81 = arith.maximumf %79, %80 : vector<16x1xf32>
    %82 = vector.shape_cast %81 : vector<16x1xf32> to vector<16x1xf32>
    %83 = vector.broadcast %82 : vector<16x1xf32> to vector<16x16xf32>
    %84 = tpu.concatenate %50, %70, %83 in 0 : vector<16x16xf32>, vector<16x16xf32>, vector<16x16xf32> -> vector<48x16xf32>
    %85 = arith.truncf %84 : vector<48x16xf32> to vector<48x16xbf16>
    %c0_42 = arith.constant 0 : index
    %c0_43 = arith.constant 0 : index
    %86 = vector.load %arg16[%c0_42, %c0_43] : memref<16x48xbf16, #tpu.memory_space<vmem>>, vector<16x48xbf16>
    %cst_44 = arith.constant dense<0.000000e+00> : vector<16x16xf32>
    %87 = tpu.matmul %86, %85, %cst_44 {dimension_numbers = #tpu.dot_dimension_numbers<[1], [0], [0], [1], [0, 0, 1, 1], [], []>} : vector<16x48xbf16>, vector<48x16xbf16>, vector<16x16xf32> -> vector<16x16xf32>
    %c0_45 = arith.constant 0 : index
    %c0_46 = arith.constant 0 : index
    %88 = vector.load %arg17[%c0_45, %c0_46] : memref<16x1xf32, #tpu.memory_space<vmem>>, vector<16x1xf32>
    %89 = vector.broadcast %88 : vector<16x1xf32> to vector<16x16xf32>
    %90 = arith.addf %87, %89 : vector<16x16xf32>
    %cst_47 = arith.constant 0.000000e+00 : f32
    %91 = vector.broadcast %cst_47 : f32 to vector<16x16xf32>
    %92 = arith.maximumf %90, %91 : vector<16x16xf32>
    %93 = arith.truncf %92 : vector<16x16xf32> to vector<16x16xbf16>
    %c0_48 = arith.constant 0 : index
    %c0_49 = arith.constant 0 : index
    %94 = vector.load %arg18[%c0_48, %c0_49] : memref<2x16xbf16, #tpu.memory_space<vmem>>, vector<2x16xbf16>
    %cst_50 = arith.constant dense<0.000000e+00> : vector<2x16xf32>
    %95 = tpu.matmul %94, %93, %cst_50 {dimension_numbers = #tpu.dot_dimension_numbers<[1], [0], [0], [1], [0, 0, 1, 1], [], []>} : vector<2x16xbf16>, vector<16x16xbf16>, vector<2x16xf32> -> vector<2x16xf32>
    %c0_51 = arith.constant 0 : index
    %c0_52 = arith.constant 0 : index
    %96 = vector.load %arg19[%c0_51, %c0_52] : memref<2x1xf32, #tpu.memory_space<vmem>>, vector<2x1xf32>
    %97 = vector.broadcast %96 : vector<2x1xf32> to vector<2x16xf32>
    %98 = arith.addf %95, %97 : vector<2x16xf32>
    %c0_53 = arith.constant 0 : index
    %c0_54 = arith.constant 0 : index
    %99 = vector.load %arg5[%c0_53, %c0_54] : memref<16x256xf32, #tpu.memory_space<vmem>>, vector<16x256xf32>
    %cst_55 = arith.constant dense<0.000000e+00> : vector<2x256xf32>
    %100 = tpu.matmul %98, %99, %cst_55 {dimension_numbers = #tpu.dot_dimension_numbers<[1], [0], [0], [1], [0, 0, 1, 1], [], []>} : vector<2x16xf32>, vector<16x256xf32>, vector<2x256xf32> -> vector<2x256xf32>
    %c0_56 = arith.constant 0 : index
    %c0_57 = arith.constant 0 : index
    %c0_58 = arith.constant 0 : index
    %101 = vector.load %arg20[%c0_56, %c0_57, %c0_58] : memref<1x2x256xf32, #tpu.memory_space<vmem>>, vector<1x2x256xf32>
    %102 = vector.shape_cast %101 : vector<1x2x256xf32> to vector<2x256xf32>
    %103 = vector.shape_cast %100 : vector<2x256xf32> to vector<1x2x256xf32>
    tpu.vector_store %arg20[%c0_56, %c0_57, %c0_58], %103 {strides = array<i32>} : memref<1x2x256xf32, #tpu.memory_space<vmem>>, vector<1x2x256xf32>,
    return
  }
  func.func @transform_0(%arg0: i32) -> (i32, i32, i32) {
    %c0_i32 = arith.constant 0 : i32
    %c0_i32_0 = arith.constant 0 : i32
    %c0_i32_1 = arith.constant 0 : i32
    return %arg0, %c0_i32, %c0_i32_0 : i32, i32, i32
  }
  func.func @transform_1(%arg0: i32) -> (i32, i32) {
    %c0_i32 = arith.constant 0 : i32
    %c0_i32_0 = arith.constant 0 : i32
    %c0_i32_1 = arith.constant 0 : i32
    return %c0_i32, %c0_i32_0 : i32, i32
  }
  func.func @transform_2(%arg0: i32) -> (i32, i32) {
    %c0_i32 = arith.constant 0 : i32
    %c0_i32_0 = arith.constant 0 : i32
    %c0_i32_1 = arith.constant 0 : i32
    return %c0_i32, %c0_i32_0 : i32, i32
  }
  func.func @transform_3(%arg0: i32) -> (i32, i32) {
    %c0_i32 = arith.constant 0 : i32
    %c0_i32_0 = arith.constant 0 : i32
    %c0_i32_1 = arith.constant 0 : i32
    return %c0_i32, %c0_i32_0 : i32, i32
  }
  func.func @transform_4(%arg0: i32) -> (i32, i32) {
    %c0_i32 = arith.constant 0 : i32
    %c0_i32_0 = arith.constant 0 : i32
    %c0_i32_1 = arith.constant 0 : i32
    return %c0_i32, %c0_i32_0 : i32, i32
  }
  func.func @transform_5(%arg0: i32) -> (i32, i32) {
    %c0_i32 = arith.constant 0 : i32
    %c0_i32_0 = arith.constant 0 : i32
    %c0_i32_1 = arith.constant 0 : i32
    return %c0_i32, %c0_i32_0 : i32, i32
  }
  func.func @transform_6(%arg0: i32) -> (i32, i32) {
    %c0_i32 = arith.constant 0 : i32
    %c0_i32_0 = arith.constant 0 : i32
    %c0_i32_1 = arith.constant 0 : i32
    return %c0_i32, %c0_i32_0 : i32, i32
  }
  func.func @transform_7(%arg0: i32) -> (i32, i32) {
    %c0_i32 = arith.constant 0 : i32
    %c0_i32_0 = arith.constant 0 : i32
    %c0_i32_1 = arith.constant 0 : i32
    return %c0_i32, %c0_i32_0 : i32, i32
  }
  func.func @transform_8(%arg0: i32) -> (i32, i32) {
    %c0_i32 = arith.constant 0 : i32
    %c0_i32_0 = arith.constant 0 : i32
    %c0_i32_1 = arith.constant 0 : i32
    return %c0_i32, %c0_i32_0 : i32, i32
  }
  func.func @transform_9(%arg0: i32) -> (i32, i32) {
    %c0_i32 = arith.constant 0 : i32
    %c0_i32_0 = arith.constant 0 : i32
    %c0_i32_1 = arith.constant 0 : i32
    return %c0_i32, %c0_i32_0 : i32, i32
  }
  func.func @transform_10(%arg0: i32) -> (i32, i32) {
    %c0_i32 = arith.constant 0 : i32
    %c0_i32_0 = arith.constant 0 : i32
    %c0_i32_1 = arith.constant 0 : i32
    return %c0_i32, %c0_i32_0 : i32, i32
  }
  func.func @transform_11(%arg0: i32) -> (i32, i32) {
    %c0_i32 = arith.constant 0 : i32
    %c0_i32_0 = arith.constant 0 : i32
    %c0_i32_1 = arith.constant 0 : i32
    return %c0_i32, %c0_i32_0 : i32, i32
  }
  func.func @transform_12(%arg0: i32) -> (i32, i32) {
    %c0_i32 = arith.constant 0 : i32
    %c0_i32_0 = arith.constant 0 : i32
    %c0_i32_1 = arith.constant 0 : i32
    return %c0_i32, %c0_i32_0 : i32, i32
  }
  func.func @transform_13(%arg0: i32) -> (i32, i32) {
    %c0_i32 = arith.constant 0 : i32
    %c0_i32_0 = arith.constant 0 : i32
    %c0_i32_1 = arith.constant 0 : i32
    return %c0_i32, %c0_i32_0 : i32, i32
  }
  func.func @transform_14(%arg0: i32) -> (i32, i32) {
    %c0_i32 = arith.constant 0 : i32
    %c0_i32_0 = arith.constant 0 : i32
    %c0_i32_1 = arith.constant 0 : i32
    return %c0_i32, %c0_i32_0 : i32, i32
  }
  func.func @transform_15(%arg0: i32) -> (i32, i32) {
    %c0_i32 = arith.constant 0 : i32
    %c0_i32_0 = arith.constant 0 : i32
    %c0_i32_1 = arith.constant 0 : i32
    return %c0_i32, %c0_i32_0 : i32, i32
  }
  func.func @transform_16(%arg0: i32) -> (i32, i32) {
    %c0_i32 = arith.constant 0 : i32
    %c0_i32_0 = arith.constant 0 : i32
    %c0_i32_1 = arith.constant 0 : i32
    return %c0_i32, %c0_i32_0 : i32, i32
  }
  func.func @transform_17(%arg0: i32) -> (i32, i32) {
    %c0_i32 = arith.constant 0 : i32
    %c0_i32_0 = arith.constant 0 : i32
    %c0_i32_1 = arith.constant 0 : i32
    return %c0_i32, %c0_i32_0 : i32, i32
  }
  func.func @transform_18(%arg0: i32) -> (i32, i32) {
    %c0_i32 = arith.constant 0 : i32
    %c0_i32_0 = arith.constant 0 : i32
    %c0_i32_1 = arith.constant 0 : i32
    return %c0_i32, %c0_i32_0 : i32, i32
  }
  func.func @transform_19(%arg0: i32) -> (i32, i32, i32) {
    %c0_i32 = arith.constant 0 : i32
    %c0_i32_0 = arith.constant 0 : i32
    %c0_i32_1 = arith.constant 0 : i32
    return %arg0, %c0_i32, %c0_i32_0 : i32, i32, i32
  }
}

</mosaic_0001>

<bundles_post_ra>
// kernel: model_wrapper_forward.1
= control target key start
LH: loop header
LB: loop body
LE: loop exit
PB: predicated region body
PF: predicated region fallthrough
CT: control target
= control target key end

     0   :  { %s3143_s0 = inlined_call_operand.vmem [shape: bf16[2,3,256], index: 0, kind: input, shape index: {}]   ;;  %s3144_s1 = inlined_call_operand.vmem [shape: bf16[256,576], index: 1, kind: input, shape index: {}]   ;;  %s3145_s2 = inlined_call_operand.vmem [shape: bf16[64,144], index: 2, kind: input, shape index: {}]   ;;  %s3146_s3 = inlined_call_operand.vmem [shape: bf16[16,144], index: 3, kind: input, shape index: {}]   ;;  %s3147_s4 = inlined_call_operand.vmem [shape: f32[16,256], index: 4, kind: input, shape index: {}]   ;;  %s3148_s5 = inlined_call_operand.vmem [shape: bf16[8,27], index: 5, kind: input, shape index: {}]   ;;  %s3149_s6 = inlined_call_operand.vmem [shape: f32[8,1], index: 6, kind: input, shape index: {}]   ;;  %s3150_s7 = inlined_call_operand.vmem [shape: bf16[16,72], index: 7, kind: input, shape index: {}]   ;;  %s3151_s8 = inlined_call_operand.vmem [shape: f32[16,1], index: 8, kind: input, shape index: {}]   ;;  %s3152_s9 = inlined_call_operand.vmem [shape: bf16[16,16], index: 9, kind: input, shape index: {}]   ;;  %s3153_s10 = inlined_call_operand.vmem [shape: f32[16,1], index: 10, kind: input, shape index: {}]   ;;  %s3154_s11 = inlined_call_operand.vmem [shape: bf16[16,144], index: 11, kind: input, shape index: {}]   ;;  %s3155_s12 = inlined_call_operand.vmem [shape: f32[16,1], index: 12, kind: input, shape index: {}]   ;;  %s3156_s13 = inlined_call_operand.vmem [shape: bf16[16,16], index: 13, kind: input, shape index: {}]   ;;  %s3157_s14 = inlined_call_operand.vmem [shape: f32[16,1], index: 14, kind: input, shape index: {}]   ;;  %s3158_s15 = inlined_call_operand.vmem [shape: bf16[16,48], index: 15, kind: input, shape index: {}]   ;;  %s3159_s16 = inlined_call_operand.vmem [shape: f32[16,1], index: 16, kind: input, shape index: {}]   ;;  %s3160_s17 = inlined_call_operand.vmem [shape: bf16[2,16], index: 17, kind: input, shape index: {}]   ;;  %s3161_s18 = inlined_call_operand.vmem [shape: f32[2,1], index: 18, kind: input, shape index: {}]   ;;  %s3162_s19 = inlined_call_operand.vmem [shape: f32[2,2,256], index: 19, kind: output, shape index: {}]  }
   0x1   :  { %3170 = sst [smem:[#allocation3_spill]] %s3143_s0  ;;  %s2650_s0 = smov 0  }
   0x2   :  { %3171 = sst [smem:[#allocation4_spill]] %s3144_s1 }
   0x3   :  { %3172 = sst [smem:[#allocation5_spill]] %s3145_s2 }
   0x4   :  { %3173 = sst [smem:[#allocation6_spill]] %s3146_s3 }
   0x5 LB: > { %3174 = sst [smem:[#allocation2_spill]] %s2537_s0  ;;  %s2155_s30 = sadd.s32 4294967295, %s2537_s0   ;;  %s2537_s0 = sphi %s2650_s0, %s29_s0  }
   0x6   : > { %p2159_p0 = scmp.ge.s32.totalorder %s2537_s0, 1  ;;  %p537_p1 = scmp.lt.s32.totalorder %s2537_s0, 3 }
   0x8   : > { %p538_p2 = pnand %p2159_p0, %p537_p1 }
   0x9   : > { %s3175_s1 = sld [smem:[#allocation4_spill]] (!%p538_p2)  ;;  %p593_p3 = scmp.lt.s32.totalorder (!%p538_p2), %s2155_s30, 1  ;;  %vm2541_vm0 = vmmov (!%p538_p2), 0   ;;  %vm1308_vm1 = vcmask (!%p538_p2), 1041408   ;;  %vm1309_vm2 = vsmask.f32 (!%p538_p2), 1280 }
   0xa   : > { %541 = sbr.rel (%p538_p2) target bundleno = 2472 (0x9a8), region = 96  ;;  %s3176_s27 = sld [smem:[#allocation3_spill]] (!%p538_p2)  ;;  %vm2949_vm3 = vmand (!%p538_p2), %vm1308_vm1, %vm1309_vm2  ;;  %vm1317_vm4 = vcmask (!%p538_p2), 1044480   ;;  %vm1318_vm5 = vsmask.f32 (!%p538_p2), 4352  ;;  %vm1312_vm6 = vcmask (!%p538_p2), 1042432  }
   0xb   : > { %vm1326_vm7 = vcmask (!%p538_p2), 1047552   ;;  %vm1327_vm8 = vsmask.f32 (!%p538_p2), 7424  ;;  %vm1319_vm9 = vmand (!%p538_p2), %vm1317_vm4, %vm1318_vm5  ;;  %vm1321_vm10 = vcmask (!%p538_p2), 1045504   ;;  %vm1336_vm11 = vsmask.f32 (!%p538_p2), 2304 }
   0xc   : > { %vm1328_vm12 = vmand (!%p538_p2), %vm1326_vm7, %vm1327_vm8  ;;  %vm1330_vm13 = vcmask (!%p538_p2), 1040384   ;;  %vm1339_vm15 = vcmask (!%p538_p2), 1043456   ;;  %s3179_s22 = sld [smem:[#allocation5_spill]] (!%p538_p2)  ;;  %vm1350_vm1 = vcmask (!%p538_p2), 220160   ;;  %vm1449_vm2 = vcmask (!%p538_p2), 523264   ;;  %s2544_s0 = smov (!%p538_p2), 96  }
   0xd   : > { %vm1337_vm14 = vmand (!%p538_p2), %vm1312_vm6, %vm1336_vm11  ;;  %s2546_s29 = smov (!%p538_p2), 80   ;;  %s3168_s21 = smov (!%p538_p2), 32   ;;  %vm1912_vm5 = vcmask (!%p538_p2), 392192  }
   0xe   : > { %s2548_s24 = smov (!%p538_p2), 48   ;;  %s2549_s25 = smov (!%p538_p2), 16  }
   0xf   : > { %v2397_v0 = vld [vmem:[%s3175_s1 + $0x4] ss:$20 sps:$4 sm:$0xff] (!%p538_p2)   ;;  %v2399_v1 = vld [vmem:[%s3175_s1 + $0xc] ss:$20 sps:$4 sm:$0xff] (!%p538_p2)   ;;  %v2402_v3 = vld [vmem:[%s3175_s1 + $0x8] ss:$20 sps:$4 sm:$0xff] (!%p538_p2)  }
  0x10   : > { %1128 = vmatprep.subr.bf16.mxu0 (!%p538_p2), %v2397_v0  ;;  %v2401_v2 = vld [vmem:[%s3175_s1] ss:$20 sps:$4 sm:$0xff] (!%p538_p2)   ;;  %1169 = vmatprep.subr.bf16.mxu1 (!%p538_p2), %v2399_v1  ;;  %v2407_v6 = vld [vmem:[%s3175_s1 + $0x28] ss:$20 sps:$4 sm:$0xff] (!%p538_p2)   ;;  %v2408_v7 = vld [vmem:[%s3175_s1 + $0x30] ss:$20 sps:$4 sm:$0xff] (!%p538_p2)  }
  0x11   : > { %v2403_v4 = vld [vmem:[%s3175_s1 + $0x2c] ss:$20 sps:$4 sm:$0xff]   ;;  %1129 = vmatpush1.bf16.msra.mxu0 %v2401_v2  ;;  %1170 = vmatpush1.bf16.msra.mxu1 %v2402_v3  ;;  %v2405_v5 = vld [vmem:[%s3175_s1 + $0x34] ss:$20 sps:$4 sm:$0xff]   ;;  %v2411_v9 = vld [vmem:[%s3175_s1 + $0x5c] ss:$20 sps:$4 sm:$0xff]  }
  0x12   : > { %1130 = vmatprep.subr.bf16.mxu0 %v2403_v4  ;;  %1171 = vmatprep.subr.bf16.mxu1 %v2405_v5  ;;  %v2409_v8 = vld [vmem:[%s3175_s1 + $0x54] ss:$20 sps:$4 sm:$0xff]   ;;  %v2413_v10 = vld [vmem:[%s3175_s1 + $0x50] ss:$20 sps:$4 sm:$0xff]   ;;  %v2414_v11 = vld [vmem:[%s3175_s1 + $0x58] ss:$20 sps:$4 sm:$0xff]  }
  0x13   : > { %v2415_v12 = vld [vmem:[%s3175_s1 + $0x7c] ss:$20 sps:$4 sm:$0xff]   ;;  %v2417_v13 = vld [vmem:[%s3175_s1 + $0x84] ss:$20 sps:$4 sm:$0xff]   ;;  %v2420_v15 = vld [vmem:[%s3175_s1 + $0x80] ss:$20 sps:$4 sm:$0xff]  }
  0x14   : > { %v2419_v14 = vld [vmem:[%s3175_s1 + $0x78] ss:$20 sps:$4 sm:$0xff]   ;;  %v2425_v18 = vld [vmem:[%s3175_s1 + $0xa0] ss:$20 sps:$4 sm:$0xff]   ;;  %v2426_v19 = vld [vmem:[%s3175_s1 + $0xa8] ss:$20 sps:$4 sm:$0xff]  }
  0x15   : > { %1131 = vmatpush1.bf16.msra.mxu0 %v2407_v6  ;;  %1172 = vmatpush1.bf16.msra.mxu1 %v2408_v7  ;;  %v2421_v16 = vld [vmem:[%s3175_s1 + $0xa4] ss:$20 sps:$4 sm:$0xff]   ;;  %v2423_v17 = vld [vmem:[%s3175_s1 + $0xac] ss:$20 sps:$4 sm:$0xff]   ;;  %v2429_v21 = vld [vmem:[%s3175_s1 + $0xd4] ss:$20 sps:$4 sm:$0xff]  }
  0x16   : > { %1132 = vmatprep.subr.bf16.mxu0 %v2409_v8  ;;  %1173 = vmatprep.subr.bf16.mxu1 %v2411_v9  ;;  %v2427_v20 = vld [vmem:[%s3175_s1 + $0xcc] ss:$20 sps:$4 sm:$0xff]   ;;  %v2431_v22 = vld [vmem:[%s3175_s1 + $0xc8] ss:$20 sps:$4 sm:$0xff]   ;;  %v2432_v23 = vld [vmem:[%s3175_s1 + $0xd0] ss:$20 sps:$4 sm:$0xff]  }
  0x17   : > { %v2433_v24 = vld [vmem:[%s3175_s1 + $0xf4] ss:$20 sps:$4 sm:$0xff]   ;;  %v2435_v25 = vld [vmem:[%s3175_s1 + $0xfc] ss:$20 sps:$4 sm:$0xff]   ;;  %v2438_v27 = vld [vmem:[%s3175_s1 + $0xf8] ss:$20 sps:$4 sm:$0xff]  }
  0x18   : > { %v2437_v26 = vld [vmem:[%s3175_s1 + $0xf0] ss:$20 sps:$4 sm:$0xff]   ;;  %v2443_v30 = vld [vmem:[%s3175_s1 + $0x118] ss:$20 sps:$4 sm:$0xff]   ;;  %v2444_v31 = vld [vmem:[%s3175_s1 + $0x120] ss:$20 sps:$4 sm:$0xff]  }
  0x19   : > { %1133 = vmatpush1.bf16.msra.mxu0 %v2413_v10  ;;  %1174 = vmatpush1.bf16.msra.mxu1 %v2414_v11  ;;  %v2439_v28 = vld [vmem:[%s3175_s1 + $0x11c] ss:$20 sps:$4 sm:$0xff]   ;;  %v2441_v29 = vld [vmem:[%s3175_s1 + $0x124] ss:$20 sps:$4 sm:$0xff]   ;;  %v2447_v33 = vld [vmem:[%s3175_s1 + $0x14c] ss:$20 sps:$4 sm:$0xff]  }
  0x1a   : > { %1134 = vmatprep.subr.bf16.mxu0 %v2415_v12  ;;  %1175 = vmatprep.subr.bf16.mxu1 %v2417_v13  ;;  %v2445_v32 = vld [vmem:[%s3175_s1 + $0x144] ss:$20 sps:$4 sm:$0xff]   ;;  %v2449_v34 = vld [vmem:[%s3175_s1 + $0x140] ss:$20 sps:$4 sm:$0xff]   ;;  %v2450_v35 = vld [vmem:[%s3175_s1 + $0x148] ss:$20 sps:$4 sm:$0xff]  }
  0x1b   : > { %v2451_v36 = vld [vmem:[%s3175_s1 + $0x16c] ss:$20 sps:$4 sm:$0xff]   ;;  %v2453_v37 = vld [vmem:[%s3175_s1 + $0x174] ss:$20 sps:$4 sm:$0xff]   ;;  %s3186_s30 = smov (!%p593_p3, %s2155_s30), 1  ;;  %s3180_s2 = sld [smem:[#allocation6_spill]] }
  0x1c   : > { %v2455_v38 = vld [vmem:[%s3175_s1 + $0x168] ss:$20 sps:$4 sm:$0xff]   ;;  %v2456_v39 = vld [vmem:[%s3175_s1 + $0x170] ss:$20 sps:$4 sm:$0xff]   ;;  %s3167_s20 = sshll.u32 %s3186_s30, 2  ;;  %s3182_s23 = smov 32  }
  0x1d   : > { %1135 = vmatpush1.bf16.msra.mxu0 %v2419_v14  ;;  %1176 = vmatpush1.bf16.msra.mxu1 %v2420_v15  ;;  %v2457_v40 = vld [vmem:[%s3175_s1 + $0x194] ss:$20 sps:$4 sm:$0xff]   ;;  %v2459_v41 = vld [vmem:[%s3175_s1 + $0x19c] ss:$20 sps:$4 sm:$0xff]   ;;  %v2462_v43 = vld [vmem:[%s3175_s1 + $0x198] ss:$20 sps:$4 sm:$0xff]   ;;  %s597_s28 = scalar_lea.vmem %s3176_s27, %s3167_s20 }
  0x1e   : > { %1136 = vmatprep.subr.bf16.mxu0 %v2421_v16  ;;  %1177 = vmatprep.subr.bf16.mxu1 %v2423_v17  ;;  %v2461_v42 = vld [vmem:[%s3175_s1 + $0x190] ss:$20 sps:$4 sm:$0xff]   ;;  %v2467_v46 = vld [vmem:[%s3175_s1 + $0x1b8] ss:$20 sps:$4 sm:$0xff]   ;;  %v2468_v47 = vld [vmem:[%s3175_s1 + $0x1c0] ss:$20 sps:$4 sm:$0xff]  }
  0x1f   : > { %v2463_v44 = vld [vmem:[%s3175_s1 + $0x1bc] ss:$20 sps:$4 sm:$0xff]   ;;  %v2465_v45 = vld [vmem:[%s3175_s1 + $0x1c4] ss:$20 sps:$4 sm:$0xff]   ;;  %v2471_v51 = vld [vmem:[%s3175_s1 + $0x1ec] ss:$20 sps:$4 sm:$0xff]  }
  0x20   : > { %v2814_v48 = vld.sshfl [vmem:[%s597_s28] sm:$0x33 pattern:$0x76325410]  ;;  %v2469_v49 = vld [vmem:[%s3175_s1 + $0x1e4] ss:$20 sps:$4 sm:$0xff]  }
  0x21   : > { %1137 = vmatpush1.bf16.msra.mxu0 %v2425_v18  ;;  %1178 = vmatpush1.bf16.msra.mxu1 %v2426_v19  ;;  %v709_v50 = vcombine.high %v2814_v48, %v2814_v48  ;;  %v2473_v52 = vld [vmem:[%s3175_s1 + $0x1e0] ss:$20 sps:$4 sm:$0xff]   ;;  %v2474_v53 = vld [vmem:[%s3175_s1 + $0x1e8] ss:$20 sps:$4 sm:$0xff]   ;;  %v2480_v57 = vld [vmem:[%s3175_s1 + $0x210] ss:$20 sps:$4 sm:$0xff]  }
  0x22   : > { %1138 = vmatprep.subr.bf16.mxu0 %v2427_v20  ;;  %1179 = vmatprep.subr.bf16.mxu1 %v2429_v21  ;;  %v2475_v54 = vld [vmem:[%s3175_s1 + $0x20c] ss:$20 sps:$4 sm:$0xff]   ;;  %v2477_v55 = vld [vmem:[%s3175_s1 + $0x214] ss:$20 sps:$4 sm:$0xff]   ;;  %v2483_v59 = vld [vmem:[%s3175_s1 + $0x23c] ss:$20 sps:$4 sm:$0xff]  }
  0x23   : > { %1160 = vmatprep.mubr.bf16.mxu0 %v709_v50  ;;  %1201 = vmatprep.mubr.bf16.mxu1 %v709_v50  ;;  %v2479_v56 = vld [vmem:[%s3175_s1 + $0x208] ss:$20 sps:$4 sm:$0xff]   ;;  %v2485_v60 = vld [vmem:[%s3175_s1 + $0x230] ss:$20 sps:$4 sm:$0xff]   ;;  %v2486_v61 = vld [vmem:[%s3175_s1 + $0x238] ss:$20 sps:$4 sm:$0xff]  }
  0x24   : > { %v2481_v58 = vld [vmem:[%s3175_s1 + $0x234] ss:$20 sps:$4 sm:$0xff]   ;;  %v2487_v62 = vld [vmem:[%s3175_s1 + $0x25c] ss:$20 sps:$4 sm:$0xff]   ;;  %v2489_v63 = vld [vmem:[%s3175_s1 + $0x264] ss:$20 sps:$4 sm:$0xff]  }
  0x25   : > { %1139 = vmatpush1.bf16.msra.mxu0 %v2431_v22  ;;  %1180 = vmatpush1.bf16.msra.mxu1 %v2432_v23  ;;  %v2491_v0 = vld [vmem:[%s3175_s1 + $0x258] ss:$20 sps:$4 sm:$0xff]   ;;  %v2492_v1 = vld [vmem:[%s3175_s1 + $0x260] ss:$20 sps:$4 sm:$0xff]   ;;  %v2493_v2 = vld [vmem:[%s3175_s1 + $0x150] ss:$20 sps:$4 sm:$0xff]  }
  0x26   : > { %1140 = vmatprep.subr.bf16.mxu0 %v2433_v24  ;;  %1181 = vmatprep.subr.bf16.mxu1 %v2435_v25  ;;  %v2494_v3 = vld [vmem:[%s3175_s1 + $0x10] ss:$20 sps:$4 sm:$0xff]   ;;  %v2495_v4 = vld [vmem:[%s3175_s1 + $0x178] ss:$20 sps:$4 sm:$0xff]   ;;  %v2497_v6 = vld [vmem:[%s3175_s1 + $0x1a0] ss:$20 sps:$4 sm:$0xff]  }
  0x27   : > { %v2496_v5 = vld [vmem:[%s3175_s1 + $0x38] ss:$20 sps:$4 sm:$0xff]   ;;  %v2498_v7 = vld [vmem:[%s3175_s1 + $0x60] ss:$20 sps:$4 sm:$0xff]   ;;  %v2499_v8 = vld [vmem:[%s3175_s1 + $0x1c8] ss:$20 sps:$4 sm:$0xff]  }
  0x28   : > { %v2500_v9 = vld [vmem:[%s3175_s1 + $0x88] ss:$20 sps:$4 sm:$0xff]   ;;  %v2501_v10 = vld [vmem:[%s3175_s1 + $0x1f0] ss:$20 sps:$4 sm:$0xff]   ;;  %v2503_v12 = vld [vmem:[%s3175_s1 + $0x218] ss:$20 sps:$4 sm:$0xff]  }
  0x29   : > { %1141 = vmatpush1.bf16.msra.mxu0 %v2437_v26  ;;  %1182 = vmatpush1.bf16.msra.mxu1 %v2438_v27  ;;  %v2502_v11 = vld [vmem:[%s3175_s1 + $0xb0] ss:$20 sps:$4 sm:$0xff]   ;;  %v2504_v13 = vld [vmem:[%s3175_s1 + $0xd8] ss:$20 sps:$4 sm:$0xff]   ;;  %v2505_v14 = vld [vmem:[%s3175_s1 + $0x240] ss:$20 sps:$4 sm:$0xff]  }
  0x2a   : > { %1142 = vmatprep.subr.bf16.mxu0 %v2439_v28  ;;  %1183 = vmatprep.subr.bf16.mxu1 %v2441_v29  ;;  %v2506_v15 = vld [vmem:[%s3175_s1 + $0x100] ss:$20 sps:$4 sm:$0xff]   ;;  %v2507_v16 = vld [vmem:[%s3175_s1 + $0x268] ss:$20 sps:$4 sm:$0xff]   ;;  %s3169_s27 = smov 64   ;;  %s2545_s28 = smov 112  }
  0x2b   : > { %v2508_v17 = vld [vmem:[%s3175_s1 + $0x128] ss:$20 sps:$4 sm:$0xff]  }
  0x2d   : > { %1143 = vmatpush1.bf16.msra.mxu0 %v2443_v30  ;;  %1184 = vmatpush1.bf16.msra.mxu1 %v2444_v31 }
  0x2e   : > { %1144 = vmatprep.subr.bf16.mxu0 %v2445_v32  ;;  %1185 = vmatprep.subr.bf16.mxu1 %v2447_v33 }
  0x31   : > { %1145 = vmatpush1.bf16.msra.mxu0 %v2449_v34  ;;  %1186 = vmatpush1.bf16.msra.mxu1 %v2450_v35 }
  0x32   : > { %1146 = vmatprep.subr.bf16.mxu0 %v2451_v36  ;;  %1187 = vmatprep.subr.bf16.mxu1 %v2453_v37 }
  0x35   : > { %1147 = vmatpush1.bf16.msra.mxu0 %v2455_v38  ;;  %1188 = vmatpush1.bf16.msra.mxu1 %v2456_v39  ;;  %v2540_v39 = vmov 0.0  }
  0x36   : > { %1148 = vmatprep.subr.bf16.mxu0 %v2457_v40  ;;  %1189 = vmatprep.subr.bf16.mxu1 %v2459_v41 }
  0x39   : > { %1149 = vmatpush1.bf16.msra.mxu0 %v2461_v42  ;;  %1190 = vmatpush1.bf16.msra.mxu1 %v2462_v43 }
  0x3a   : > { %1150 = vmatprep.subr.bf16.mxu0 %v2463_v44  ;;  %1191 = vmatprep.subr.bf16.mxu1 %v2465_v45 }
  0x3d   : > { %1151 = vmatpush1.bf16.msra.mxu0 %v2467_v46  ;;  %1192 = vmatpush1.bf16.msra.mxu1 %v2468_v47 }
  0x3e   : > { %1152 = vmatprep.subr.bf16.mxu0 %v2469_v49  ;;  %1193 = vmatprep.subr.bf16.mxu1 %v2471_v51  ;;  %v1344_v49 = vld [vmem:[%s3149_s6] sm:$0xff] }
  0x41   : > { %1153 = vmatpush1.bf16.msra.mxu0 %v2473_v52  ;;  %1194 = vmatpush1.bf16.msra.mxu1 %v2474_v53 }
  0x42   : > { %1154 = vmatprep.subr.bf16.mxu0 %v2475_v54  ;;  %1195 = vmatprep.subr.bf16.mxu1 %v2477_v55 }
  0x45   : > { %1155 = vmatpush1.bf16.msra.mxu0 %v2479_v56  ;;  %1196 = vmatpush1.bf16.msra.mxu1 %v2480_v57 }
  0x46   : > { %1156 = vmatprep.subr.bf16.mxu0 %v2481_v58  ;;  %1197 = vmatprep.subr.bf16.mxu1 %v2483_v59 }
  0x49   : > { %1157 = vmatpush1.bf16.msra.mxu0 %v2485_v60  ;;  %1198 = vmatpush1.bf16.msra.mxu1 %v2486_v61 }
  0x4a   : > { %1158 = vmatprep.subr.bf16.mxu0 %v2487_v62  ;;  %1199 = vmatprep.subr.bf16.mxu1 %v2489_v63 }
  0x4d   : > { %1159 = vmatpush1.bf16.msra.mxu0 %v2491_v0  ;;  %1200 = vmatpush1.bf16.msra.mxu1 %v2492_v1 }
  0x4e   : > { %2276 = vmatprep.subr.bf16.mxu0 %v2493_v2  ;;  %2317 = vmatprep.subr.bf16.mxu1 %v2540_v39 }
  0x50   : > { %1161 = vmatmul.mubr.bf16.vlgmr.msra.gmra.mrb[0].mxu0 %v2814_v48  ;;  %1202 = vmatmul.mubr.bf16.vlgmr.msra.gmra.mrb[0].mxu1 %v2814_v48 }
  0x51   : > { %2277 = vmatpush3.bf16.msra.mxu0 %v2494_v3  ;;  %1242 = vmatprep.mubr.bf16.mxu0 %v709_v50  ;;  %v2542_v50 = vmov 0   ;;  %v2543_v3 = vmov 65535  }
  0x52   : > { %2278 = vmatprep.subr.bf16.mxu0 %v2495_v4  ;;  %2321 = vmatprep.mubr.msk.bf16.mxu1 %vm2541_vm0, %v2540_v39  ;;  %v1355_v4 = vsel %vm1317_vm4, 4294967295, %v2543_v3  ;;  %vm1617_vm4 = vcmask 130048  }
  0x53   : > { %2390 = vset.pattern.permute.xlu1 %v2542_v50  ;;  %2391 = vset.pattern.permute.xlu0 %v2542_v50 }
  0x55   : > { %2279 = vmatpush3.bf16.msra.mxu0 %v2496_v5 }
  0x56   : > { %2280 = vmatprep.subr.bf16.mxu0 %v2497_v6 }
  0x59   : > { %2281 = vmatpush3.bf16.msra.mxu0 %v2498_v7 }
  0x5a   : > { %2282 = vmatprep.subr.bf16.mxu0 %v2499_v8 }
  0x5d   : > { %2283 = vmatpush3.bf16.msra.mxu0 %v2500_v9 }
  0x5e   : > { %2284 = vmatprep.subr.bf16.mxu0 %v2501_v10 }
  0x61   : > { %2285 = vmatpush3.bf16.msra.mxu0 %v2502_v11  ;;  %v1356_v11 = vsel %vm1321_vm10, %v1355_v4, 0  ;;  %v2525_v4 = vld [vmem:[%s3180_s2 + $0x4] ss:$8 sps:$4 sm:$0xff]  }
  0x62   : > { %2286 = vmatprep.subr.bf16.mxu0 %v2503_v12 }
  0x65   : > { %2287 = vmatpush3.bf16.msra.mxu0 %v2504_v13 }
  0x66   : > { %2288 = vmatprep.subr.bf16.mxu0 %v2505_v14 }
  0x69   : > { %2289 = vmatpush3.bf16.msra.mxu0 %v2506_v15  ;;  %v2511_v15 = vld [vmem:[%s3179_s22 + $0x4] ss:$8 sps:$4 sm:$0xff]  }
  0x6a   : > { %2290 = vmatprep.subr.bf16.mxu0 %v2507_v16 }
  0x6d   : > { %2291 = vmatpush3.bf16.msra.mxu0 %v2508_v17  ;;  %v1343_v17 = vld [vmem:[%s3148_s5] sm:$0xf] }
  0x6e   : > { %2339 = vmatprep.subr.bf16.mxu0 %v2540_v39 }
  0x70   : > { %1243 = vmatmul.mubr.bf16.vlgmr.msra.gmra.mrb[4].mxu0 %v2814_v48 }
  0x71   : > { %2341 = vmatprep.mubr.msk.bf16.mxu0 %vm2541_vm0, %v2540_v39 }
 0x123   : > { %v1162_v18 = vpop.f32.mrb[0].mxu0  ;;  %v1203_v19 = vpop.f32.mrb[0].mxu1 }
 0x124   : > { %v2917_v20 = vpack.c.bf16 %v1162_v18, %v1162_v18  ;;  %v2919_v21 = vpack.c.bf16 %v1203_v19, %v1203_v19  ;;  %v1164_v22 = vpop.f32.mrb[1].mxu0  ;;  %v1205_v23 = vpop.f32.mrb[1].mxu1  ;;  %v2509_v18 = vld [vmem:[%s3179_s22] ss:$8 sps:$4 sm:$0xff]   ;;  %v2514_v19 = vld [vmem:[%s3179_s22 + $0x14] ss:$8 sps:$4 sm:$0xff]  }
 0x125   : > { %v2921_v24 = vpack.c.bf16 %v1164_v22, %v1164_v22  ;;  %v1166_v25 = vpop.f32.mrb[2].mxu0  ;;  %v1207_v26 = vpop.f32.mrb[2].mxu1  ;;  %v2927_v33 = vpack.c.bf16 %v1205_v23, %v1205_v23  ;;  %v2515_v22 = vld [vmem:[%s3179_s22 + $0x20] ss:$8 sps:$4 sm:$0xff]   ;;  %v2520_v23 = vld [vmem:[%s3179_s22 + $0x34] ss:$8 sps:$4 sm:$0xff]  }
 0x126   : > { %v1285_v27 = vshrl.u32 %v2919_v21, 16  ;;  %v1167_v28 = vpop.f32.mrb[3].mxu0  ;;  %v1208_v29 = vpop.f32.mrb[3].mxu1  ;;  %v1282_v30 = vshll.u32 %v2919_v21, 16  ;;  %v1256_v31 = vshrl.u32 %v2917_v20, 16  ;;  %v1259_v37 = vshll.u32 %v2917_v20, 16 }
 0x127   : > { %v1269_v32 = vshrl.u32 %v2921_v24, 16  ;;  %v1272_v35 = vshll.u32 %v2921_v24, 16  ;;  %v1296_v41 = vshrl.u32 %v2927_v33, 16  ;;  %v1299_v44 = vshll.u32 %v2927_v33, 16 }
 0x128   : > { %v1284_v34 = vrot.slane %v1282_v30, 1  ;;  %v1258_v36 = vrot.slane %v1256_v31, 6  ;;  %v1261_v40 = vrot.slane %v1259_v37, 7  ;;  %v1267_v61 = vrot.slane %v2921_v24, 5  ;;  %v2518_v24 = vld [vmem:[%s3179_s22 + $0x30] ss:$8 sps:$4 sm:$0xff]  }
 0x129   : > { %v1271_v42 = vrot.slane %v1269_v32, 3  ;;  %v1274_v43 = vrot.slane %v1272_v35, 4  ;;  %v1298_v46 = vrot.slane %v1296_v41, 5  ;;  %v1301_v47 = vrot.slane %v1299_v44, 6  ;;  %v1531_v41 = vld [vmem:[%s3151_s8 + $0x8] sm:$0xff] }
 0x12a   : > { %1288 = vrot.lane.b32.xlu1 %v1284_v34, %s3169_s27  ;;  %v1287_v38 = vor.u32 %v1285_v27, %v1284_v34  ;;  %v1262_v45 = vor.u32 %v1261_v40, %v1258_v36  ;;  %v1280_v63 = vrot.slane %v2919_v21, 2  ;;  %v1294_v6 = vrot.slane %v2927_v33, 7  ;;  %v2517_v21 = vld [vmem:[%s3179_s22 + $0x24] ss:$8 sps:$4 sm:$0xff]  }
 0x12b   : > { %v1275_v48 = vor.u32 %v1274_v43, %v1271_v42  ;;  %v1302_v51 = vor.u32 %v1301_v47, %v1298_v46  ;;  %v1530_v40 = vld [vmem:[%s3151_s8] sm:$0xff] }
 0x12c   : > { %1263 = vrot.lane.b32.xlu0 %v1262_v45, %s3169_s27 }
 0x12e   : > { %1290 = vrot.lane.b32.xlu1 %v1287_v38, %s3169_s27 }
 0x130   : > { %1276 = vrot.lane.b32.xlu0 %v1275_v48, %s3169_s27 }
 0x132   : > { %1347 = vperm.xlu1 %2390, %v1344_v49  }
 0x134   : > { %1303 = vrot.lane.b32.xlu0 %v1302_v51, %s3169_s27 }
 0x143   : > { %v2292_v52 = vpop.f32.mrb[4].mxu0 }
 0x144   : > { %v2293_v53 = vpop.f32.mrb[5].mxu0 }
 0x145   : > { %v2294_v54 = vadd.f32 %v2293_v53, %v2292_v52  ;;  %v2295_v55 = vpop.f32.mrb[6].mxu0 }
 0x146   : > { %v2296_v56 = vpop.f32.mrb[7].mxu0 }
 0x147   : > { %v1254_v62 = vpack.c.bf16 %v2294_v54, %v2294_v54  ;;  %v2521_v56 = vld [vmem:[%s3150_s7] sm:$0xff]  }
 0x149   : > { %v1307_v7 = vrot.slane %v1254_v62, 4 }
 0x19c   : > { %v1289_v58 = vpop.permute.xlu1 %1288 }
 0x19e   : > { %v1264_v59 = vpop.permute.xlu0 %1263 }
 0x19f   : > { %v1311_v60 = vsel %vm2949_vm3, %v2917_v20, %v1264_v59  ;;  %v2512_v20 = vld [vmem:[%s3179_s22 + $0x10] ss:$8 sps:$4 sm:$0xff]   ;;  %vm1547_vm3 = vcmask 588800  }
 0x1a0   : > { %v1315_v1 = vsel %vm1312_vm6, %v1311_v60, %v1267_v61  ;;  %v1291_v2 = vpop.permute.xlu1 %1290 }
 0x1a1   : > { %v1333_v10 = vsel %vm1330_vm13, %v1291_v2, %v1294_v6 }
 0x1a2   : > { %v1277_v0 = vpop.permute.xlu0 %1276 }
 0x1a3   : > { %v1320_v5 = vsel %vm1319_vm9, %v1315_v1, %v1277_v0 }
 0x1a4   : > { %v1324_v8 = vsel %vm1321_vm10, %v1320_v5, %v1280_v63 }
 0x1a5   : > { %v1329_v9 = vsel %vm1328_vm12, %v1324_v8, %v1289_v58  ;;  %v2523_v8 = vld [vmem:[%s3180_s2] ss:$8 sps:$4 sm:$0xff]  }
 0x1a6   : > { %v1304_v12 = vpop.permute.xlu0 %1303  ;;  %2318 = vmatpush3.bf16.msra.mxu1 %v1329_v9 }
 0x1a7   : > { %v1338_v13 = vsel %vm1337_vm14, %v1333_v10, %v1304_v12  ;;  %2319 = vmatprep.subr.bf16.mxu1 %v2540_v39 }
 0x1a8   : > { %v1342_v14 = vsel %vm1339_vm15, %v1338_v13, %v1307_v7  ;;  %v2522_v7 = vld [vmem:[%s3152_s9] sm:$0xff]  }
 0x1a9   : > { %v1357_v16 = vand.u32 %v1356_v11, %v1342_v14  ;;  %v2526_v14 = vld [vmem:[%s3156_s13] sm:$0xff]  }
 0x1ab   : > { %2320 = vmatpush3.bf16.msra.mxu1 %v1357_v16 }
 0x1ac   : > { %1453 = vmatprep.subr.bf16.mxu1 %v2511_v15 }
 0x1ae   : > { %2322 = vmatmul.mubr.msk.bf16.vlgmr.msra.gmra.mrb[4].mxu1 %vm1350_vm1, %v1343_v17 }
 0x1af   : > { %1454 = vmatpush1.bf16.msra.mxu1 %v2509_v18  ;;  %1485 = vmatprep.mubr.bf16.mxu1 %v2542_v50 }
 0x1b0   : > { %1455 = vmatprep.subr.bf16.mxu1 %v2514_v19 }
 0x1b1   : > { %v1348_v25 = vpop.permute.xlu1 %1347 }
 0x1b3   : > { %1456 = vmatpush1.bf16.msra.mxu1 %v2512_v20 }
 0x1b4   : > { %1457 = vmatprep.subr.bf16.mxu1 %v2517_v21 }
 0x1b7   : > { %1458 = vmatpush1.bf16.msra.mxu1 %v2515_v22 }
 0x1b8   : > { %1459 = vmatprep.subr.bf16.mxu1 %v2520_v23 }
 0x1bb   : > { %1460 = vmatpush1.bf16.msra.mxu1 %v2518_v24 }
 0x1bc   : > { %2325 = vmatprep.subr.bf16.mxu1 %v2540_v39 }
 0x281   : > { %v1393_v26 = vpop.f32.mrb[4].mxu1 }
 0x282   : > { %v1394_v27 = vadd.f32 %v1393_v26, %v1348_v25  ;;  %v2323_v28 = vpop.f32.mrb[5].mxu1  ;;  %v1601_v25 = vld [vmem:[%s3153_s10 + $0x8] sm:$0xff] }
 0x283   : > { %v1396_v29 = vpop.f32.mrb[6].mxu1  ;;  %v1749_v26 = vld [vmem:[%s3155_s12 + $0x8] sm:$0xff] }
 0x284   : > { %v1399_v30 = vmax.f32 %v1394_v27, 0.0  ;;  %v2324_v31 = vpop.f32.mrb[7].mxu1  ;;  %v1600_v27 = vld [vmem:[%s3153_s10] sm:$0xff] }
 0x285   : > { %v2527_v28 = vld [vmem:[%s3154_s11 + $0x4] ss:$8 sps:$4 sm:$0xff]   ;;  %v1961_v31 = vld [vmem:[%s3161_s18] sm:$0x3] }
 0x286   : > { %v1400_v32 = vpack.c.bf16 %v1399_v30, %v1399_v30  ;;  %v1895_v29 = vld [vmem:[%s3159_s16] sm:$0xff] }
 0x287   : > { %v1748_v30 = vld [vmem:[%s3155_s12] sm:$0xff] }
 0x288   : > { %2254 = vmatmul.mubr.msk.bf16.vlgmr.msra.gmra.mrb[8].mxu1 %vm1449_vm2, %v1400_v32 }
 0x289   : > { %2335 = vmatprep.mubr.msk.bf16.mxu1 %vm2541_vm0, %v2540_v39 }
 0x35b   : > { %v1487_v33 = vpop.f32.mrb[8].mxu1 }
 0x35c   : > { %v1494_v34 = vpack.c.bf16 %v1487_v33, %v1487_v33  ;;  %v1489_v35 = vpop.f32.mrb[9].mxu1 }
 0x35d   : > { %v1491_v36 = vpop.f32.mrb[10].mxu1  ;;  %v1495_v53 = vpack.c.bf16 %v1489_v35, %v1489_v35 }
 0x35e   : > { %1500 = vrot.lane.b32.xlu1 %v1494_v34, %s2544_s0  ;;  %v1492_v37 = vpop.f32.mrb[11].mxu1  ;;  %v1497_v38 = vrot.slane %v1494_v34, 4 }
 0x35f   : > { %v1552_v55 = vsel %vm1339_vm15, %v1495_v53, 0  ;;  %v1827_v37 = vld [vmem:[%s3157_s14] sm:$0xff] }
 0x360   : > { %1498 = vrot.lane.b32.xlu0 %v1497_v38, %s2545_s28 }
 0x362   : > { %1504 = vrot.lane.b32.xlu1 %v1494_v34, %s3169_s27 }
 0x364   : > { %1502 = vrot.lane.b32.xlu0 %v1497_v38, %s2546_s29 }
 0x366   : > { %1508 = vrot.lane.b32.xlu1 %v1494_v34, %s3168_s21  ;;  %s3181_s21 = smov 64  }
 0x368   : > { %1506 = vrot.lane.b32.xlu0 %v1497_v38, %s2548_s24 }
 0x36a   : > { %1534 = vperm.xlu1 %2390, %v1530_v40   ;;  %v1828_v40 = vld [vmem:[%s3157_s14 + $0x8] sm:$0xff] }
 0x36c   : > { %1510 = vrot.lane.b32.xlu0 %v1497_v38, %s2549_s25 }
 0x370   : > { %1539 = vperm.xlu0 %2391, %v1531_v41  }
 0x3d0   : > { %v1501_v42 = vpop.permute.xlu1 %1500 }
 0x3d2   : > { %v1499_v43 = vpop.permute.xlu0 %1498 }
 0x3d3   : > { %v1514_v44 = vsel %vm1339_vm15, %v1494_v34, %v1499_v43 }
 0x3d4   : > { %2326 = vmatpush3.bf16.msra.mxu1 %v1514_v44  ;;  %v1505_v47 = vpop.permute.xlu1 %1504 }
 0x3d5   : > { %2327 = vmatprep.subr.bf16.mxu1 %v2540_v39 }
 0x3d6   : > { %v1503_v45 = vpop.permute.xlu0 %1502 }
 0x3d7   : > { %v1518_v46 = vsel %vm1339_vm15, %v1501_v42, %v1503_v45 }
 0x3d8   : > { %2328 = vmatpush3.bf16.msra.mxu1 %v1518_v46  ;;  %v1509_v51 = vpop.permute.xlu1 %1508 }
 0x3d9   : > { %2329 = vmatprep.subr.bf16.mxu1 %v2540_v39 }
 0x3da   : > { %v1507_v48 = vpop.permute.xlu0 %1506 }
 0x3db   : > { %v1522_v49 = vsel %vm1339_vm15, %v1505_v47, %v1507_v48 }
 0x3dc   : > { %2330 = vmatpush3.bf16.msra.mxu1 %v1522_v49 }
 0x3dd   : > { %2331 = vmatprep.subr.bf16.mxu1 %v2540_v39 }
 0x3de   : > { %v1511_v52 = vpop.permute.xlu0 %1510 }
 0x3df   : > { %v1526_v54 = vsel %vm1339_vm15, %v1509_v51, %v1511_v52 }
 0x3e0   : > { %2332 = vmatpush3.bf16.msra.mxu1 %v1526_v54  ;;  %v1896_v54 = vld [vmem:[%s3159_s16 + $0x8] sm:$0xff] }
 0x3e1   : > { %2333 = vmatprep.subr.bf16.mxu1 %v2540_v39 }
 0x3e4   : > { %2334 = vmatpush3.bf16.msra.mxu1 %v1552_v55  ;;  %v2529_v55 = vld [vmem:[%s3154_s11] ss:$8 sps:$4 sm:$0xff]  }
 0x3e5   : > { %1772 = vmatprep.subr.bf16.mxu1 %v2542_v50 }
 0x3e7   : > { %2336 = vmatmul.mubr.msk.bf16.vlgmr.msra.gmra.mrb[12].mxu1 %vm1547_vm3, %v2521_v56 }
 0x3e8   : > { %2264 = vmatprep.mubr.msk.bf16.mxu1 %vm1617_vm4, %v2527_v28  ;;  %v2012_v28 = vld [vmem:[%s3147_s4 + $0x10] sm:$0xff] }
 0x3e9   : > { %v1535_v57 = vpop.permute.xlu1 %1534 }
 0x3ef   : > { %v1540_v59 = vpop.permute.xlu0 %1539 }
 0x4ba   : > { %v1588_v58 = vpop.f32.mrb[12].mxu1 }
 0x4bb   : > { %v1589_v60 = vadd.f32 %v1588_v58, %v1535_v57  ;;  %v2337_v61 = vpop.f32.mrb[13].mxu1 }
 0x4bc   : > { %v1591_v62 = vpop.f32.mrb[14].mxu1 }
 0x4bd   : > { %v1595_v63 = vmax.f32 %v1589_v60, 0.0  ;;  %v1592_v0 = vadd.f32 %v1591_v62, %v1540_v59  ;;  %v2338_v1 = vpop.f32.mrb[15].mxu1 }
 0x4bf   : > { %v1596_v2 = vmax.f32 %v1592_v0, 0.0  ;;  %v1815_v3 = vsel %vm1617_vm4, %v1595_v63, 0.0 }
 0x4c0   : > { %1816 = vadd.xlane.f32.xlu1 %v1815_v3 }
 0x4c1   : > { %v1597_v5 = vpack.c.bf16 %v1596_v2, %v1595_v63  ;;  %v1818_v6 = vsel %vm1617_vm4, %v1596_v2, 0.0 }
 0x4c2   : > { %1819 = vadd.xlane.f32.xlu0 %v1818_v6 }
 0x4c3   : > { %2340 = vmatpush3.bf16.msra.mxu0 %v1597_v5 }
 0x4c4   : > { %1679 = vmatprep.subr.bf16.mxu0 %v2525_v4 }
 0x4c6   : > { %2342 = vmatmul.mubr.msk.bf16.vlgmr.msra.gmra.mrb[8].mxu0 %vm1617_vm4, %v2522_v7 }
 0x4c7   : > { %1680 = vmatpush1.bf16.msra.mxu0 %v2523_v8  ;;  %1711 = vmatprep.mubr.bf16.mxu0 %v2542_v50 }
 0x4c8   : > { %2345 = vmatprep.subr.bf16.mxu0 %v2540_v39 }
 0x4ce   : > { %2261 = vmatmul.mubr.msk.bf16.vlgmr.msra.gmra.mrb[12].mxu0 %vm1617_vm4, %v1597_v5 }
 0x4cf   : > { %2347 = vmatprep.mubr.msk.bf16.mxu0 %vm2541_vm0, %v2540_v39 }
 0x54d   : > { %v1817_v9 = vpop.xlane.xlu1 %1816 }
 0x54e   : > { %v1822_v11 = vmul.f32 0.0625, %v1817_v9 }
 0x54f   : > { %v1820_v10 = vpop.xlane.xlu0 %1819 }
 0x550   : > { %v1823_v12 = vmul.f32 0.0625, %v1820_v10 }
 0x552   : > { %v1824_v13 = vpack.c.bf16 %v1823_v12, %v1822_v11  ;;  %v2530_v11 = vld [vmem:[%s3158_s15] sm:$0xff]  }
 0x554   : > { %2346 = vmatpush3.bf16.msra.mxu0 %v1824_v13 }
 0x555   : > { %2351 = vmatprep.subr.bf16.mxu0 %v2540_v39 }
 0x557   : > { %2348 = vmatmul.mubr.msk.bf16.vlgmr.msra.gmra.mrb[16].mxu0 %vm1617_vm4, %v2526_v14 }
 0x558   : > { %2357 = vmatprep.mubr.msk.bf16.mxu0 %vm2541_vm0, %v2540_v39 }
 0x599   : > { %v3048_v15 = vpop.f32.mrb[8].mxu0 }
 0x59a   : > { %v2343_v16 = vpop.f32.mrb[9].mxu0 }
 0x59b   : > { %v3050_v17 = vpop.f32.mrb[10].mxu0 }
 0x59c   : > { %v2344_v18 = vpop.f32.mrb[11].mxu0 }
 0x5a1   : > { %v1713_v19 = vpop.f32.mrb[12].mxu0 }
 0x5a2   : > { %v3052_v20 = vpop.f32.mrb[13].mxu0 }
 0x5a3   : > { %v1717_v21 = vpop.f32.mrb[14].mxu0 }
 0x5a4   : > { %v1722_v22 = vpack.c.bf16 %v1717_v21, %v1713_v19  ;;  %v3054_v23 = vpop.f32.mrb[15].mxu0  ;;  %v2013_v21 = vld [vmem:[%s3147_s4 + $0x18] sm:$0xff] }
 0x5a5   : > { %v1723_v24 = vpack.c.bf16 %v3054_v23, %v3052_v20  ;;  %v2011_v20 = vld [vmem:[%s3147_s4 + $0x8] sm:$0xff] }
 0x5a6   : > { %1728 = vrot.lane.b32.xlu0 %v1722_v22, %s2544_s0  ;;  %1725 = vrot.lane.b32.xlu1 %v1722_v22, %s2545_s28 }
 0x5a7   : > { %1773 = vmatpush1.bf16.msra.mxu1 %v1722_v22 }
 0x5a8   : > { %1774 = vmatprep.subr.bf16.mxu1 %v2542_v50 }
 0x5aa   : > { %1737 = vrot.lane.b32.xlu0 %v1722_v22, %s2548_s24  ;;  %1731 = vrot.lane.b32.xlu1 %v1722_v22, %s2546_s29 }
 0x5ae   : > { %1743 = vrot.lane.b32.xlu0 %v1722_v22, %s2549_s25  ;;  %1734 = vrot.lane.b32.xlu1 %v1722_v22, %s3181_s21 }
 0x5b2   : > { %1609 = vperm.xlu0 %2391, %v1601_v25   ;;  %1740 = vrot.lane.b32.xlu1 %v1722_v22, %s3182_s23  ;;  %s3183_s23 = sshll.u32 %s3186_s30, 2 }
 0x5b3   : > { %s602_s20 = scalar_lea.vmem %s3162_s19, %s3183_s23 }
 0x5b6   : > { %1757 = vperm.xlu0 %2391, %v1749_v26   ;;  %1604 = vperm.xlu1 %2390, %v1600_v27   ;;  %v1960_v26 = vld [vmem:[%s3160_s17] sm:$0x1] }
 0x5b7   : > { %v2010_v27 = vld [vmem:[%s3147_s4] sm:$0xff] }
 0x5ba   : > { %1899 = vperm.xlu0 %2391, %v1895_v29   ;;  %1752 = vperm.xlu1 %2390, %v1748_v30   ;;  %v2369_v29 = vpack.c.bf16 %v2012_v28, %v2010_v27 }
 0x5be   : > { %1964 = vperm.xlu0 %2391, %v1961_v31  }
 0x618   : > { %v1726_v32 = vpop.permute.xlu1 %1725  ;;  %v1729_v33 = vpop.permute.xlu0 %1728 }
 0x619   : > { %1775 = vmatpush1.bf16.msra.mxu1 %v1726_v32 }
 0x61a   : > { %1776 = vmatprep.subr.bf16.mxu1 %v2542_v50 }
 0x61c   : > { %v1732_v34 = vpop.permute.xlu1 %1731  ;;  %v1738_v36 = vpop.permute.xlu0 %1737 }
 0x61d   : > { %1777 = vmatpush1.bf16.msra.mxu1 %v1729_v33 }
 0x61e   : > { %1778 = vmatprep.subr.bf16.mxu1 %v2542_v50 }
 0x620   : > { %v1735_v35 = vpop.permute.xlu1 %1734  ;;  %v1744_v45 = vpop.permute.xlu0 %1743 }
 0x621   : > { %1779 = vmatpush1.bf16.msra.mxu1 %v1732_v34 }
 0x622   : > { %1780 = vmatprep.subr.bf16.mxu1 %v2542_v50 }
 0x624   : > { %v1741_v43 = vpop.permute.xlu1 %1740 }
 0x625   : > { %1781 = vmatpush1.bf16.msra.mxu1 %v1735_v35 }
 0x626   : > { %1782 = vmatprep.subr.bf16.mxu1 %v2542_v50 }
 0x629   : > { %1783 = vmatpush1.bf16.msra.mxu1 %v1738_v36 }
 0x62a   : > { %v1871_v38 = vpop.f32.mrb[16].mxu0  ;;  %1784 = vmatprep.subr.bf16.mxu1 %v2542_v50 }
 0x62b   : > { %v1872_v41 = vadd.f32 %v1871_v38, %v1827_v37  ;;  %v2349_v42 = vpop.f32.mrb[17].mxu0 }
 0x62c   : > { %v1874_v44 = vpop.f32.mrb[18].mxu0 }
 0x62d   : > { %v1878_v46 = vmax.f32 %v1872_v41, 0.0  ;;  %v1875_v47 = vadd.f32 %v1874_v44, %v1828_v40  ;;  %1785 = vmatpush1.bf16.msra.mxu1 %v1741_v43  ;;  %v2350_v48 = vpop.f32.mrb[19].mxu0 }
 0x62e   : > { %1786 = vmatprep.subr.bf16.mxu1 %v2542_v50 }
 0x62f   : > { %v1879_v49 = vmax.f32 %v1875_v47, 0.0 }
 0x631   : > { %v2392_v51 = vpack.i.bf16 %v1879_v49, %v1878_v46  ;;  %v1610_v52 = vpop.permute.xlu0 %1609  ;;  %1787 = vmatpush1.bf16.msra.mxu1 %v1744_v45 }
 0x632   : > { %1788 = vmatprep.subr.bf16.mxu1 %v2542_v50  ;;  %v1659_v53 = vadd.f32 %v3050_v17, %v1610_v52 }
 0x633   : > { %2393 = vperm.xlu1 %2390, %v2392_v51  }
 0x634   : > { %v1663_v58 = vmax.f32 %v1659_v53, 0.0 }
 0x635   : > { %v1605_v56 = vpop.permute.xlu1 %1604  ;;  %1789 = vmatpush1.bf16.msra.mxu1 %v1723_v24  ;;  %v1758_v0 = vpop.permute.xlu0 %1757  ;;  %v2367_v24 = vpack.c.bf16 %v2013_v21, %v2011_v20 }
 0x636   : > { %v1656_v57 = vadd.f32 %v3048_v15, %v1605_v56 }
 0x637   : > { %1904 = vperm.xlu1 %2390, %v1896_v54  }
 0x638   : > { %v1662_v59 = vmax.f32 %v1656_v57, 0.0  ;;  %1805 = vmatmul.mubr.bf16.vlgmr.msra.gmra.mrb[16].mxu1 %v2529_v55 }
 0x639   : > { %v1753_v60 = vpop.permute.xlu1 %1752  ;;  %v1900_v12 = vpop.permute.xlu0 %1899 }
 0x63a   : > { %v1890_v50 = vpack.c.bf16 %v1663_v58, %v1662_v59 }
 0x63c   : > { %2352 = vmatpush3.bf16.msra.mxu0 %v1890_v50 }
 0x63d   : > { %2353 = vmatprep.subr.bf16.mxu0 %v2540_v39  ;;  %v1965_v30 = vpop.permute.xlu0 %1964 }
 0x6b2   : > { %v2394_v4 = vpop.permute.xlu1 %2393 }
 0x6b3   : > { %v2396_v7 = vunpack.i.h.bf16 %v2394_v4  ;;  %v2395_v8 = vunpack.i.l.bf16 %v2394_v4 }
 0x6b5   : > { %v1892_v10 = vpack.c.bf16 %v2396_v7, %v2395_v8 }
 0x6b6   : > { %v1905_v16 = vpop.permute.xlu1 %1904 }
 0x70b   : > { %v1806_v61 = vpop.f32.mrb[16].mxu1 }
 0x70c   : > { %v1807_v62 = vadd.f32 %v1806_v61, %v1753_v60  ;;  %v1808_v63 = vpop.f32.mrb[17].mxu1 }
 0x70d   : > { %v1809_v1 = vpop.f32.mrb[18].mxu1 }
 0x70e   : > { %v1810_v2 = vadd.f32 %v1809_v1, %v1758_v0  ;;  %v1811_v3 = vpop.f32.mrb[19].mxu1  ;;  %v1813_v5 = vmax.f32 %v1807_v62, 0.0 }
 0x710   : > { %v1814_v6 = vmax.f32 %v1810_v2, 0.0 }
 0x712   : > { %v1891_v9 = vpack.c.bf16 %v1814_v6, %v1813_v5 }
 0x714   : > { %2354 = vmatpush3.bf16.msra.mxu0 %v1891_v9 }
 0x715   : > { %2355 = vmatprep.subr.bf16.mxu0 %v2540_v39 }
 0x718   : > { %2356 = vmatpush3.bf16.msra.mxu0 %v1892_v10 }
 0x719   : > { %2361 = vmatprep.subr.bf16.mxu0 %v2540_v39 }
 0x71b   : > { %2358 = vmatmul.mubr.msk.bf16.vlgmr.msra.gmra.mrb[20].mxu0 %vm1912_vm5, %v2530_v11 }
 0x71c   : > { %2363 = vmatprep.mubr.msk.bf16.mxu0 %vm2541_vm0, %v2540_v39 }
 0x7ee   : > { %v1950_v13 = vpop.f32.mrb[20].mxu0 }
 0x7ef   : > { %v1951_v14 = vadd.f32 %v1950_v13, %v1900_v12  ;;  %v2359_v15 = vpop.f32.mrb[21].mxu0 }
 0x7f0   : > { %v1953_v17 = vpop.f32.mrb[22].mxu0 }
 0x7f1   : > { %v1954_v18 = vadd.f32 %v1953_v17, %v1905_v16  ;;  %v2360_v19 = vpop.f32.mrb[23].mxu0  ;;  %v1957_v22 = vmax.f32 %v1951_v14, 0.0 }
 0x7f3   : > { %v1958_v23 = vmax.f32 %v1954_v18, 0.0 }
 0x7f5   : > { %v1959_v25 = vpack.c.bf16 %v1958_v23, %v1957_v22 }
 0x7f7   : > { %2362 = vmatpush3.bf16.msra.mxu0 %v1959_v25 }
 0x7f8   : > { %2368 = vmatprep.subr.bf16.mxu0 %v2367_v24 }
 0x7fa   : > { %2364 = vmatmul.mubr.msk.bf16.vlgmr.msra.gmra.mrb[24].mxu0 %vm1617_vm4, %v1960_v26 }
 0x7fb   : > { %2081 = vmatprep.mubr.f32.mxu0 %v2540_v39  ;;  %2370 = vmatpush1.bf16.msra.mxu0 %v2369_v29 }
 0x8cd   : > { %v2004_v31 = vpop.f32.mrb[24].mxu0 }
 0x8ce   : > { %v2005_v32 = vadd.f32 %v2004_v31, %v1965_v30  ;;  %v2365_v33 = vpop.f32.mrb[25].mxu0 }
 0x8cf   : > { %v2007_v34 = vpop.f32.mrb[26].mxu0 }
 0x8d0   : > { %2270 = vmatmul.mubr.msk.f32.vlgmr.msra.gmra.mrb[28].mxu0 %vm1617_vm4, %v2005_v32  ;;  %v2366_v35 = vpop.f32.mrb[27].mxu0 }
 0x9a3   : > { %v2083_v36 = vpop.f32.mrb[28].mxu0 }
 0x9a4   : > { %v2085_v39 = vpop.f32.mrb[29].mxu0 }
 0x9a5   : > { %v2090_v37 = vcombine.low %v2083_v36, %v2085_v39 }
 0x9a7   : > { %2271 = vst.sshfl [vmem:[%s602_s20] sm:$0x33 pattern:$0x76325410] %v2090_v37 }
 0x9a8 PF: > { %s3184_s27 = sld [smem:[#allocation2_spill]] }
 0x9ae   : > { %s29_s0 = sadd.s32 1, %s3184_s27  }
 0x9af   : > { %p26_p4 = scmp.ge.s32.totalorder %s29_s0, 4  }
 0x9b1   :  { %28 = sbr.rel (!%p26_p4) target bundleno = 5 (0x5), region = 126 }

</bundles_post_ra>
